<compile_context>
chip_gen: v7x
topology: tpu7x:2x2x1
jax: 0.10.0
libtpu: 0.0.40
codegen_flags: <defaults>
</compile_context>

<pallas_src>
import jax
import jax.numpy as jnp
from jax.experimental import pallas as pl
from jax.experimental.pallas import tpu as pltpu

V = 16      # i_size (vocab)
H = 32      # h_size (hidden)
T = 8       # demo sequence length
LANE = 128  # TPU vreg lane width; each GRU gate gets its own 128-lane group


def _encoder_gru_kernel(tok_ref,    # (T, 1)         int32 token ids
                        emb_ref,    # (V, H)         f32 embedding table
                        wih_ref,    # (H, 3*LANE)    f32 W_ih^T, gates at lane offsets 0/128/256
                        whh_ref,    # (LANE, 3*LANE) f32 W_hh^T, rows >= H zero-padded
                        bi_ref,     # (1, 3*LANE)    f32 folded biases [b_ir+b_hr, b_iz+b_hz, b_in]
                        bhn_ref,    # (1, LANE)      f32 b_hn (kept separate for r*(gh_n+b_hn))
                        h0_ref,     # (1, LANE)      f32 initial hidden, zero-padded past H
                        out_ref):   # (T, H)         f32 hidden state after every step
    seq_len, h_size = out_ref.shape
    vocab = emb_ref.shape[0]
    lane = bhn_ref.shape[1]

    # ---------------------- prologue (off the serial path) ----------------------
    # Embedding lookup for all seq_len tokens at once.  V is tiny, so an exact
    # select-accumulate over the table rows is the simplest bit-exact gather.
    tok = tok_ref[...]                                        # (T, 1) int32
    x = jnp.zeros((seq_len, h_size), jnp.float32)
    for v in range(vocab):
        x = jnp.where(tok == v, emb_ref[v:v + 1, :], x)       # (T,1) cond, (1,H) row -> (T,H)
    # TODO(synk): at a real vocab size, replace this with a scalar-prefetch-driven
    # row-gather DMA; at V=16 the whole table is 2 KiB so it just lives in VMEM.

    # Input-side gate pre-activations for ALL steps in one matmul: (T,H)@(H,3*LANE).
    gi = jnp.dot(x, wih_ref[...], preferred_element_type=jnp.float32) + bi_ref[...]
    gi_r = gi[:, 0 * lane:1 * lane]                           # vreg-aligned lane slices
    gi_z = gi[:, 1 * lane:2 * lane]
    gi_n = gi[:, 2 * lane:3 * lane]

    whh = whh_ref[...]
    bhn = bhn_ref[...]

    # ------------------ serial recurrence (fully unrolled) ----------------------
    # Static Python loop == lax.fori_loop(0, T, ..., unroll=True) with static
    # indices; T is a small compile-time constant, so the LLO scheduler sees the
    # whole chain and every slice below is static and vreg-aligned.
    h = h0_ref[...]                                           # (1, LANE)
    outs = []
    for t in range(seq_len):
        gh = jnp.dot(h, whh, preferred_element_type=jnp.float32)        # (1, 3*LANE)
        r = jax.nn.sigmoid(gi_r[t:t + 1] + gh[:, 0 * lane:1 * lane])
        z = jax.nn.sigmoid(gi_z[t:t + 1] + gh[:, 1 * lane:2 * lane])
        n = jnp.tanh(gi_n[t:t + 1] + r * (gh[:, 2 * lane:3 * lane] + bhn))
        h = (1.0 - z) * n + z * h                                        # (1, LANE)
        outs.append(h)

    # One contiguous output store (single HBM writeback) instead of T masked ones.
    out_ref[...] = jnp.concatenate(outs, axis=0)[:, :h_size]

# TODO(synk): batching independent sequences (B>=8 sublane fill, a "parallel"
# batch axis / core_map for v7x's second TensorCore) would change the module's
# batch=1 semantics, so it is not done here.


def pack_params(params):
    """One-time packing of PyTorch-layout GRU params into the kernel layout.

    Each gate [r, z, n] gets its own 128-lane column group so every in-kernel
    gate slice is vreg-aligned; W_hh^T is also zero-padded to 128 rows so the
    hidden state can be carried as a single (1, 128) row.
    """
    emb = params["embedding"].astype(jnp.float32)       # (V, H)
    w_ih = params["w_ih"].astype(jnp.float32)           # (3H, H), rows [r, z, n]
    w_hh = params["w_hh"].astype(jnp.float32)           # (3H, H)
    b_ih = params["b_ih"].astype(jnp.float32)           # (3H,)
    b_hh = params["b_hh"].astype(jnp.float32)           # (3H,)

    wih = jnp.zeros((H, 3 * LANE), jnp.float32)
    whh = jnp.zeros((LANE, 3 * LANE), jnp.float32)
    bi = jnp.zeros((1, 3 * LANE), jnp.float32)
    for g in range(3):                                   # gate order [r, z, n]
        wih = wih.at[:, g * LANE:g * LANE + H].set(w_ih[g * H:(g + 1) * H, :].T)
        whh = whh.at[:H, g * LANE:g * LANE + H].set(w_hh[g * H:(g + 1) * H, :].T)
    # Fold b_hr / b_hz into the input-side bias; b_in also lives there.  b_hn must
    # stay separate because of the r * (h W_hn^T + b_hn) term.
    bi = bi.at[:, 0 * LANE:0 * LANE + H].set((b_ih[0:H] + b_hh[0:H])[None, :])
    bi = bi.at[:, 1 * LANE:1 * LANE + H].set((b_ih[H:2 * H] + b_hh[H:2 * H])[None, :])
    bi = bi.at[:, 2 * LANE:2 * LANE + H].set(b_ih[2 * H:3 * H][None, :])
    bhn = jnp.zeros((1, LANE), jnp.float32).at[:, :H].set(b_hh[2 * H:3 * H][None, :])

    return {"emb": emb, "wih": wih, "whh": whh, "bi": bi, "bhn": bhn}


def encoder_rnn_sequence(tokens, hidden, packed):
    """Run the EncoderRNN over a token sequence inside ONE pallas_call.

    tokens: (T,) int; hidden: (1, 1, H) float32.
    Returns (outputs (T, 1, H), final hidden (1, 1, H)) -- identical to calling
    the PyTorch forward once per token and threading the hidden state.
    """
    seq_len = int(tokens.shape[0])
    tok2d = tokens.astype(jnp.int32).reshape(seq_len, 1)
    h0 = jnp.zeros((1, LANE), jnp.float32).at[:, :H].set(
        hidden.reshape(1, H).astype(jnp.float32))

    vmem = pl.BlockSpec(memory_space=pltpu.MemorySpace.VMEM)   # whole array, VMEM-resident
    out = pl.pallas_call(
        _encoder_gru_kernel,
        out_shape=jax.ShapeDtypeStruct((seq_len, H), jnp.float32),
        in_specs=[vmem] * 7,
        out_specs=vmem,
    )(tok2d, packed["emb"], packed["wih"], packed["whh"],
      packed["bi"], packed["bhn"], h0)

    outputs = out.reshape(seq_len, 1, H)
    hidden_final = out[seq_len - 1].reshape(1, 1, H)
    return outputs, hidden_final


def encoder_rnn_forward(token, hidden, packed):
    """Single-step forward matching the PyTorch module exactly.

    token: scalar int; hidden: (1, 1, H). Returns (output, hidden), both (1, 1, H).
    """
    tok = jnp.asarray(token, dtype=jnp.int32).reshape(1)
    outputs, hidden_final = encoder_rnn_sequence(tok, hidden, packed)
    return outputs.reshape(1, 1, H), hidden_final


def _reference_sequence(tokens, hidden, params):
    """Pure-JAX reference of the PyTorch forward applied token-by-token."""
    emb, w_ih, w_hh, b_ih, b_hh = (params["embedding"], params["w_ih"],
                                   params["w_hh"], params["b_ih"], params["b_hh"])
    h = hidden.reshape(1, H)
    outs = []
    for t in range(tokens.shape[0]):
        x = emb[tokens[t]].reshape(1, H)
        gi = x @ w_ih.T + b_ih
        gh = h @ w_hh.T + b_hh
        i_r, i_z, i_n = gi[:, :H], gi[:, H:2 * H], gi[:, 2 * H:]
        h_r, h_z, h_n = gh[:, :H], gh[:, H:2 * H], gh[:, 2 * H:]
        r = jax.nn.sigmoid(i_r + h_r)
        z = jax.nn.sigmoid(i_z + h_z)
        n = jnp.tanh(i_n + r * h_n)
        h = (1.0 - z) * n + z * h
        outs.append(h)
    return jnp.stack(outs, axis=0), h.reshape(1, 1, H)          # (T, 1, H), (1, 1, H)


def init_params(key):
    """Deterministic params with PyTorch-like shapes/init (uniform +-1/sqrt(H))."""
    k_emb, k_wih, k_whh, k_bih, k_bhh = jax.random.split(key, 5)
    s = 1.0 / jnp.sqrt(jnp.float32(H))
    return {
        "embedding": jax.random.normal(k_emb, (V, H), dtype=jnp.float32),
        "w_ih": jax.random.uniform(k_wih, (3 * H, H), jnp.float32, -s, s),
        "w_hh": jax.random.uniform(k_whh, (3 * H, H), jnp.float32, -s, s),
        "b_ih": jax.random.uniform(k_bih, (3 * H,), jnp.float32, -s, s),
        "b_hh": jax.random.uniform(k_bhh, (3 * H,), jnp.float32, -s, s),
    }


if __name__ == "__main__":
    key = jax.random.PRNGKey(0)
    k_params, k_tok, k_h = jax.random.split(key, 3)
    params = init_params(k_params)
    packed = pack_params(params)                               # one-time packing

    tokens = jax.random.randint(k_tok, (T,), 0, V, dtype=jnp.int32)
    hidden0 = jnp.zeros((1, 1, H), dtype=jnp.float32)          # EncoderRNN.initHidden()

    # Sequence path: whole recurrence inside one grid-less pallas_call.
    outs, h_final = encoder_rnn_sequence(tokens, hidden0, packed)
    outs, h_final = jax.block_until_ready((outs, h_final))

    ref_outs, ref_h = _reference_sequence(tokens, hidden0, params)
    assert outs.shape == (T, 1, H) and h_final.shape == (1, 1, H)
    assert jnp.allclose(outs, ref_outs, atol=1e-5, rtol=1e-5)
    assert jnp.allclose(h_final, ref_h, atol=1e-5, rtol=1e-5)

    # Single-step path: exact PyTorch forward signature, with a non-zero hidden.
    hidden_r = jax.random.normal(k_h, (1, 1, H), dtype=jnp.float32)
    out1, h1 = encoder_rnn_forward(tokens[0], hidden_r, packed)
    out1, h1 = jax.block_until_ready((out1, h1))
    ref1_o, ref1_h = _reference_sequence(tokens[:1], hidden_r, params)
    assert out1.shape == (1, 1, H) and h1.shape == (1, 1, H)
    assert jnp.allclose(out1, ref1_o.reshape(1, 1, H), atol=1e-5, rtol=1e-5)
    assert jnp.allclose(h1, ref1_h, atol=1e-5, rtol=1e-5)

    print("KERNEL_OK")
</pallas_src>

<mosaic_0001>
module attributes {stable_mosaic.version = 11 : i64} {
  func.func @_encoder_gru_kernel(%arg0: memref<8x1xi32, #tpu.memory_space<vmem>>, %arg1: memref<16x32xf32, #tpu.memory_space<vmem>>, %arg2: memref<32x384xf32, #tpu.memory_space<vmem>>, %arg3: memref<128x384xf32, #tpu.memory_space<vmem>>, %arg4: memref<1x384xf32, #tpu.memory_space<vmem>>, %arg5: memref<1x128xf32, #tpu.memory_space<vmem>>, %arg6: memref<1x128xf32, #tpu.memory_space<vmem>>, %arg7: memref<8x32xf32, #tpu.memory_space<vmem>>) attributes {dimension_semantics = [], scalar_prefetch = 0 : i64, scratch_operands = 0 : i64, tpu.core_type = #tpu.core_type<tc>} {
    %c0 = arith.constant 0 : index
    %c0_0 = arith.constant 0 : index
    %0 = vector.load %arg0[%c0, %c0_0] : memref<8x1xi32, #tpu.memory_space<vmem>>, vector<8x1xi32>
    %cst = arith.constant 0.000000e+00 : f32
    %1 = vector.broadcast %cst : f32 to vector<8x32xf32>
    %c0_i32 = arith.constant 0 : i32
    %2 = vector.broadcast %c0_i32 : i32 to vector<8x1xi32>
    %3 = arith.cmpi eq, %0, %2 : vector<8x1xi32>
    %c0_1 = arith.constant 0 : index
    %c0_2 = arith.constant 0 : index
    %4 = vector.load %arg1[%c0_1, %c0_2] : memref<16x32xf32, #tpu.memory_space<vmem>>, vector<1x32xf32>
    %5 = vector.shape_cast %3 : vector<8x1xi1> to vector<8x1xi1>
    %6 = vector.broadcast %5 : vector<8x1xi1> to vector<8x32xi1>
    %7 = vector.shape_cast %4 : vector<1x32xf32> to vector<1x32xf32>
    %8 = vector.broadcast %7 : vector<1x32xf32> to vector<8x32xf32>
    %9 = arith.select %6, %8, %1 : vector<8x32xi1>, vector<8x32xf32>
    %c1_i32 = arith.constant 1 : i32
    %10 = vector.broadcast %c1_i32 : i32 to vector<8x1xi32>
    %11 = arith.cmpi eq, %0, %10 : vector<8x1xi32>
    %c1 = arith.constant 1 : index
    %c0_3 = arith.constant 0 : index
    %12 = vector.load %arg1[%c1, %c0_3] : memref<16x32xf32, #tpu.memory_space<vmem>>, vector<1x32xf32>
    %13 = vector.shape_cast %11 : vector<8x1xi1> to vector<8x1xi1>
    %14 = vector.broadcast %13 : vector<8x1xi1> to vector<8x32xi1>
    %15 = vector.shape_cast %12 : vector<1x32xf32> to vector<1x32xf32>
    %16 = vector.broadcast %15 : vector<1x32xf32> to vector<8x32xf32>
    %17 = arith.select %14, %16, %9 : vector<8x32xi1>, vector<8x32xf32>
    %c2_i32 = arith.constant 2 : i32
    %18 = vector.broadcast %c2_i32 : i32 to vector<8x1xi32>
    %19 = arith.cmpi eq, %0, %18 : vector<8x1xi32>
    %c2 = arith.constant 2 : index
    %c0_4 = arith.constant 0 : index
    %20 = vector.load %arg1[%c2, %c0_4] : memref<16x32xf32, #tpu.memory_space<vmem>>, vector<1x32xf32>
    %21 = vector.shape_cast %19 : vector<8x1xi1> to vector<8x1xi1>
    %22 = vector.broadcast %21 : vector<8x1xi1> to vector<8x32xi1>
    %23 = vector.shape_cast %20 : vector<1x32xf32> to vector<1x32xf32>
    %24 = vector.broadcast %23 : vector<1x32xf32> to vector<8x32xf32>
    %25 = arith.select %22, %24, %17 : vector<8x32xi1>, vector<8x32xf32>
    %c3_i32 = arith.constant 3 : i32
    %26 = vector.broadcast %c3_i32 : i32 to vector<8x1xi32>
    %27 = arith.cmpi eq, %0, %26 : vector<8x1xi32>
    %c3 = arith.constant 3 : index
    %c0_5 = arith.constant 0 : index
    %28 = vector.load %arg1[%c3, %c0_5] : memref<16x32xf32, #tpu.memory_space<vmem>>, vector<1x32xf32>
    %29 = vector.shape_cast %27 : vector<8x1xi1> to vector<8x1xi1>
    %30 = vector.broadcast %29 : vector<8x1xi1> to vector<8x32xi1>
    %31 = vector.shape_cast %28 : vector<1x32xf32> to vector<1x32xf32>
    %32 = vector.broadcast %31 : vector<1x32xf32> to vector<8x32xf32>
    %33 = arith.select %30, %32, %25 : vector<8x32xi1>, vector<8x32xf32>
    %c4_i32 = arith.constant 4 : i32
    %34 = vector.broadcast %c4_i32 : i32 to vector<8x1xi32>
    %35 = arith.cmpi eq, %0, %34 : vector<8x1xi32>
    %c4 = arith.constant 4 : index
    %c0_6 = arith.constant 0 : index
    %36 = vector.load %arg1[%c4, %c0_6] : memref<16x32xf32, #tpu.memory_space<vmem>>, vector<1x32xf32>
    %37 = vector.shape_cast %35 : vector<8x1xi1> to vector<8x1xi1>
    %38 = vector.broadcast %37 : vector<8x1xi1> to vector<8x32xi1>
    %39 = vector.shape_cast %36 : vector<1x32xf32> to vector<1x32xf32>
    %40 = vector.broadcast %39 : vector<1x32xf32> to vector<8x32xf32>
    %41 = arith.select %38, %40, %33 : vector<8x32xi1>, vector<8x32xf32>
    %c5_i32 = arith.constant 5 : i32
    %42 = vector.broadcast %c5_i32 : i32 to vector<8x1xi32>
    %43 = arith.cmpi eq, %0, %42 : vector<8x1xi32>
    %c5 = arith.constant 5 : index
    %c0_7 = arith.constant 0 : index
    %44 = vector.load %arg1[%c5, %c0_7] : memref<16x32xf32, #tpu.memory_space<vmem>>, vector<1x32xf32>
    %45 = vector.shape_cast %43 : vector<8x1xi1> to vector<8x1xi1>
    %46 = vector.broadcast %45 : vector<8x1xi1> to vector<8x32xi1>
    %47 = vector.shape_cast %44 : vector<1x32xf32> to vector<1x32xf32>
    %48 = vector.broadcast %47 : vector<1x32xf32> to vector<8x32xf32>
    %49 = arith.select %46, %48, %41 : vector<8x32xi1>, vector<8x32xf32>
    %c6_i32 = arith.constant 6 : i32
    %50 = vector.broadcast %c6_i32 : i32 to vector<8x1xi32>
    %51 = arith.cmpi eq, %0, %50 : vector<8x1xi32>
    %c6 = arith.constant 6 : index
    %c0_8 = arith.constant 0 : index
    %52 = vector.load %arg1[%c6, %c0_8] : memref<16x32xf32, #tpu.memory_space<vmem>>, vector<1x32xf32>
    %53 = vector.shape_cast %51 : vector<8x1xi1> to vector<8x1xi1>
    %54 = vector.broadcast %53 : vector<8x1xi1> to vector<8x32xi1>
    %55 = vector.shape_cast %52 : vector<1x32xf32> to vector<1x32xf32>
    %56 = vector.broadcast %55 : vector<1x32xf32> to vector<8x32xf32>
    %57 = arith.select %54, %56, %49 : vector<8x32xi1>, vector<8x32xf32>
    %c7_i32 = arith.constant 7 : i32
    %58 = vector.broadcast %c7_i32 : i32 to vector<8x1xi32>
    %59 = arith.cmpi eq, %0, %58 : vector<8x1xi32>
    %c7 = arith.constant 7 : index
    %c0_9 = arith.constant 0 : index
    %60 = vector.load %arg1[%c7, %c0_9] : memref<16x32xf32, #tpu.memory_space<vmem>>, vector<1x32xf32>
    %61 = vector.shape_cast %59 : vector<8x1xi1> to vector<8x1xi1>
    %62 = vector.broadcast %61 : vector<8x1xi1> to vector<8x32xi1>
    %63 = vector.shape_cast %60 : vector<1x32xf32> to vector<1x32xf32>
    %64 = vector.broadcast %63 : vector<1x32xf32> to vector<8x32xf32>
    %65 = arith.select %62, %64, %57 : vector<8x32xi1>, vector<8x32xf32>
    %c8_i32 = arith.constant 8 : i32
    %66 = vector.broadcast %c8_i32 : i32 to vector<8x1xi32>
    %67 = arith.cmpi eq, %0, %66 : vector<8x1xi32>
    %c8 = arith.constant 8 : index
    %c0_10 = arith.constant 0 : index
    %68 = vector.load %arg1[%c8, %c0_10] : memref<16x32xf32, #tpu.memory_space<vmem>>, vector<1x32xf32>
    %69 = vector.shape_cast %67 : vector<8x1xi1> to vector<8x1xi1>
    %70 = vector.broadcast %69 : vector<8x1xi1> to vector<8x32xi1>
    %71 = vector.shape_cast %68 : vector<1x32xf32> to vector<1x32xf32>
    %72 = vector.broadcast %71 : vector<1x32xf32> to vector<8x32xf32>
    %73 = arith.select %70, %72, %65 : vector<8x32xi1>, vector<8x32xf32>
    %c9_i32 = arith.constant 9 : i32
    %74 = vector.broadcast %c9_i32 : i32 to vector<8x1xi32>
    %75 = arith.cmpi eq, %0, %74 : vector<8x1xi32>
    %c9 = arith.constant 9 : index
    %c0_11 = arith.constant 0 : index
    %76 = vector.load %arg1[%c9, %c0_11] : memref<16x32xf32, #tpu.memory_space<vmem>>, vector<1x32xf32>
    %77 = vector.shape_cast %75 : vector<8x1xi1> to vector<8x1xi1>
    %78 = vector.broadcast %77 : vector<8x1xi1> to vector<8x32xi1>
    %79 = vector.shape_cast %76 : vector<1x32xf32> to vector<1x32xf32>
    %80 = vector.broadcast %79 : vector<1x32xf32> to vector<8x32xf32>
    %81 = arith.select %78, %80, %73 : vector<8x32xi1>, vector<8x32xf32>
    %c10_i32 = arith.constant 10 : i32
    %82 = vector.broadcast %c10_i32 : i32 to vector<8x1xi32>
    %83 = arith.cmpi eq, %0, %82 : vector<8x1xi32>
    %c10 = arith.constant 10 : index
    %c0_12 = arith.constant 0 : index
    %84 = vector.load %arg1[%c10, %c0_12] : memref<16x32xf32, #tpu.memory_space<vmem>>, vector<1x32xf32>
    %85 = vector.shape_cast %83 : vector<8x1xi1> to vector<8x1xi1>
    %86 = vector.broadcast %85 : vector<8x1xi1> to vector<8x32xi1>
    %87 = vector.shape_cast %84 : vector<1x32xf32> to vector<1x32xf32>
    %88 = vector.broadcast %87 : vector<1x32xf32> to vector<8x32xf32>
    %89 = arith.select %86, %88, %81 : vector<8x32xi1>, vector<8x32xf32>
    %c11_i32 = arith.constant 11 : i32
    %90 = vector.broadcast %c11_i32 : i32 to vector<8x1xi32>
    %91 = arith.cmpi eq, %0, %90 : vector<8x1xi32>
    %c11 = arith.constant 11 : index
    %c0_13 = arith.constant 0 : index
    %92 = vector.load %arg1[%c11, %c0_13] : memref<16x32xf32, #tpu.memory_space<vmem>>, vector<1x32xf32>
    %93 = vector.shape_cast %91 : vector<8x1xi1> to vector<8x1xi1>
    %94 = vector.broadcast %93 : vector<8x1xi1> to vector<8x32xi1>
    %95 = vector.shape_cast %92 : vector<1x32xf32> to vector<1x32xf32>
    %96 = vector.broadcast %95 : vector<1x32xf32> to vector<8x32xf32>
    %97 = arith.select %94, %96, %89 : vector<8x32xi1>, vector<8x32xf32>
    %c12_i32 = arith.constant 12 : i32
    %98 = vector.broadcast %c12_i32 : i32 to vector<8x1xi32>
    %99 = arith.cmpi eq, %0, %98 : vector<8x1xi32>
    %c12 = arith.constant 12 : index
    %c0_14 = arith.constant 0 : index
    %100 = vector.load %arg1[%c12, %c0_14] : memref<16x32xf32, #tpu.memory_space<vmem>>, vector<1x32xf32>
    %101 = vector.shape_cast %99 : vector<8x1xi1> to vector<8x1xi1>
    %102 = vector.broadcast %101 : vector<8x1xi1> to vector<8x32xi1>
    %103 = vector.shape_cast %100 : vector<1x32xf32> to vector<1x32xf32>
    %104 = vector.broadcast %103 : vector<1x32xf32> to vector<8x32xf32>
    %105 = arith.select %102, %104, %97 : vector<8x32xi1>, vector<8x32xf32>
    %c13_i32 = arith.constant 13 : i32
    %106 = vector.broadcast %c13_i32 : i32 to vector<8x1xi32>
    %107 = arith.cmpi eq, %0, %106 : vector<8x1xi32>
    %c13 = arith.constant 13 : index
    %c0_15 = arith.constant 0 : index
    %108 = vector.load %arg1[%c13, %c0_15] : memref<16x32xf32, #tpu.memory_space<vmem>>, vector<1x32xf32>
    %109 = vector.shape_cast %107 : vector<8x1xi1> to vector<8x1xi1>
    %110 = vector.broadcast %109 : vector<8x1xi1> to vector<8x32xi1>
    %111 = vector.shape_cast %108 : vector<1x32xf32> to vector<1x32xf32>
    %112 = vector.broadcast %111 : vector<1x32xf32> to vector<8x32xf32>
    %113 = arith.select %110, %112, %105 : vector<8x32xi1>, vector<8x32xf32>
    %c14_i32 = arith.constant 14 : i32
    %114 = vector.broadcast %c14_i32 : i32 to vector<8x1xi32>
    %115 = arith.cmpi eq, %0, %114 : vector<8x1xi32>
    %c14 = arith.constant 14 : index
    %c0_16 = arith.constant 0 : index
    %116 = vector.load %arg1[%c14, %c0_16] : memref<16x32xf32, #tpu.memory_space<vmem>>, vector<1x32xf32>
    %117 = vector.shape_cast %115 : vector<8x1xi1> to vector<8x1xi1>
    %118 = vector.broadcast %117 : vector<8x1xi1> to vector<8x32xi1>
    %119 = vector.shape_cast %116 : vector<1x32xf32> to vector<1x32xf32>
    %120 = vector.broadcast %119 : vector<1x32xf32> to vector<8x32xf32>
    %121 = arith.select %118, %120, %113 : vector<8x32xi1>, vector<8x32xf32>
    %c15_i32 = arith.constant 15 : i32
    %122 = vector.broadcast %c15_i32 : i32 to vector<8x1xi32>
    %123 = arith.cmpi eq, %0, %122 : vector<8x1xi32>
    %c15 = arith.constant 15 : index
    %c0_17 = arith.constant 0 : index
    %124 = vector.load %arg1[%c15, %c0_17] : memref<16x32xf32, #tpu.memory_space<vmem>>, vector<1x32xf32>
    %125 = vector.shape_cast %123 : vector<8x1xi1> to vector<8x1xi1>
    %126 = vector.broadcast %125 : vector<8x1xi1> to vector<8x32xi1>
    %127 = vector.shape_cast %124 : vector<1x32xf32> to vector<1x32xf32>
    %128 = vector.broadcast %127 : vector<1x32xf32> to vector<8x32xf32>
    %129 = arith.select %126, %128, %121 : vector<8x32xi1>, vector<8x32xf32>
    %c0_18 = arith.constant 0 : index
    %c0_19 = arith.constant 0 : index
    %130 = vector.load %arg2[%c0_18, %c0_19] : memref<32x384xf32, #tpu.memory_space<vmem>>, vector<32x384xf32>
    %cst_20 = arith.constant dense<0.000000e+00> : vector<8x384xf32>
    %131 = tpu.matmul %129, %130, %cst_20 {dimension_numbers = #tpu.dot_dimension_numbers<[1], [0], [0], [1], [0, 0, 1, 1], [], []>} : vector<8x32xf32>, vector<32x384xf32>, vector<8x384xf32> -> vector<8x384xf32>
    %c0_21 = arith.constant 0 : index
    %c0_22 = arith.constant 0 : index
    %132 = vector.load %arg4[%c0_21, %c0_22] : memref<1x384xf32, #tpu.memory_space<vmem>>, vector<1x384xf32>
    %133 = vector.broadcast %132 : vector<1x384xf32> to vector<8x384xf32>
    %134 = arith.addf %131, %133 : vector<8x384xf32>
    %135 = vector.extract_strided_slice %134 {offsets = [0, 0], sizes = [8, 128], strides = [1, 1]} : vector<8x384xf32> to vector<8x128xf32>
    %136 = vector.extract_strided_slice %134 {offsets = [0, 128], sizes = [8, 128], strides = [1, 1]} : vector<8x384xf32> to vector<8x128xf32>
    %137 = vector.extract_strided_slice %134 {offsets = [0, 256], sizes = [8, 128], strides = [1, 1]} : vector<8x384xf32> to vector<8x128xf32>
    %c0_23 = arith.constant 0 : index
    %c0_24 = arith.constant 0 : index
    %138 = vector.load %arg3[%c0_23, %c0_24] : memref<128x384xf32, #tpu.memory_space<vmem>>, vector<128x384xf32>
    %c0_25 = arith.constant 0 : index
    %c0_26 = arith.constant 0 : index
    %139 = vector.load %arg5[%c0_25, %c0_26] : memref<1x128xf32, #tpu.memory_space<vmem>>, vector<1x128xf32>
    %c0_27 = arith.constant 0 : index
    %c0_28 = arith.constant 0 : index
    %140 = vector.load %arg6[%c0_27, %c0_28] : memref<1x128xf32, #tpu.memory_space<vmem>>, vector<1x128xf32>
    %cst_29 = arith.constant dense<0.000000e+00> : vector<1x384xf32>
    %141 = tpu.matmul %140, %138, %cst_29 {dimension_numbers = #tpu.dot_dimension_numbers<[1], [0], [0], [1], [0, 0, 1, 1], [], []>} : vector<1x128xf32>, vector<128x384xf32>, vector<1x384xf32> -> vector<1x384xf32>
    %142 = vector.extract_strided_slice %135 {offsets = [0, 0], sizes = [1, 128], strides = [1, 1]} : vector<8x128xf32> to vector<1x128xf32>
    %143 = vector.extract_strided_slice %141 {offsets = [0, 0], sizes = [1, 128], strides = [1, 1]} : vector<1x384xf32> to vector<1x128xf32>
    %144 = arith.addf %142, %143 : vector<1x128xf32>
    %145 = arith.negf %144 : vector<1x128xf32>
    %146 = math.exp %145 : vector<1x128xf32>
    %cst_30 = arith.constant 1.000000e+00 : f32
    %147 = vector.broadcast %cst_30 : f32 to vector<1x128xf32>
    %148 = arith.addf %147, %146 : vector<1x128xf32>
    %149 = arith.divf %147, %148 : vector<1x128xf32>
    %150 = vector.extract_strided_slice %136 {offsets = [0, 0], sizes = [1, 128], strides = [1, 1]} : vector<8x128xf32> to vector<1x128xf32>
    %151 = vector.extract_strided_slice %141 {offsets = [0, 128], sizes = [1, 128], strides = [1, 1]} : vector<1x384xf32> to vector<1x128xf32>
    %152 = arith.addf %150, %151 : vector<1x128xf32>
    %153 = arith.negf %152 : vector<1x128xf32>
    %154 = math.exp %153 : vector<1x128xf32>
    %cst_31 = arith.constant 1.000000e+00 : f32
    %155 = vector.broadcast %cst_31 : f32 to vector<1x128xf32>
    %156 = arith.addf %155, %154 : vector<1x128xf32>
    %157 = arith.divf %155, %156 : vector<1x128xf32>
    %158 = vector.extract_strided_slice %137 {offsets = [0, 0], sizes = [1, 128], strides = [1, 1]} : vector<8x128xf32> to vector<1x128xf32>
    %159 = vector.extract_strided_slice %141 {offsets = [0, 256], sizes = [1, 128], strides = [1, 1]} : vector<1x384xf32> to vector<1x128xf32>
    %160 = arith.addf %159, %139 : vector<1x128xf32>
    %161 = arith.mulf %149, %160 : vector<1x128xf32>
    %162 = arith.addf %158, %161 : vector<1x128xf32>
    %163 = math.tanh %162 : vector<1x128xf32>
    %cst_32 = arith.constant 1.000000e+00 : f32
    %164 = vector.broadcast %cst_32 : f32 to vector<1x128xf32>
    %165 = arith.subf %164, %157 : vector<1x128xf32>
    %166 = arith.mulf %165, %163 : vector<1x128xf32>
    %167 = arith.mulf %157, %140 : vector<1x128xf32>
    %168 = arith.addf %166, %167 : vector<1x128xf32>
    %cst_33 = arith.constant dense<0.000000e+00> : vector<1x384xf32>
    %169 = tpu.matmul %168, %138, %cst_33 {dimension_numbers = #tpu.dot_dimension_numbers<[1], [0], [0], [1], [0, 0, 1, 1], [], []>} : vector<1x128xf32>, vector<128x384xf32>, vector<1x384xf32> -> vector<1x384xf32>
    %170 = vector.extract_strided_slice %135 {offsets = [1, 0], sizes = [1, 128], strides = [1, 1]} : vector<8x128xf32> to vector<1x128xf32>
    %171 = vector.extract_strided_slice %169 {offsets = [0, 0], sizes = [1, 128], strides = [1, 1]} : vector<1x384xf32> to vector<1x128xf32>
    %172 = arith.addf %170, %171 : vector<1x128xf32>
    %173 = arith.negf %172 : vector<1x128xf32>
    %174 = math.exp %173 : vector<1x128xf32>
    %cst_34 = arith.constant 1.000000e+00 : f32
    %175 = vector.broadcast %cst_34 : f32 to vector<1x128xf32>
    %176 = arith.addf %175, %174 : vector<1x128xf32>
    %177 = arith.divf %175, %176 : vector<1x128xf32>
    %178 = vector.extract_strided_slice %136 {offsets = [1, 0], sizes = [1, 128], strides = [1, 1]} : vector<8x128xf32> to vector<1x128xf32>
    %179 = vector.extract_strided_slice %169 {offsets = [0, 128], sizes = [1, 128], strides = [1, 1]} : vector<1x384xf32> to vector<1x128xf32>
    %180 = arith.addf %178, %179 : vector<1x128xf32>
    %181 = arith.negf %180 : vector<1x128xf32>
    %182 = math.exp %181 : vector<1x128xf32>
    %cst_35 = arith.constant 1.000000e+00 : f32
    %183 = vector.broadcast %cst_35 : f32 to vector<1x128xf32>
    %184 = arith.addf %183, %182 : vector<1x128xf32>
    %185 = arith.divf %183, %184 : vector<1x128xf32>
    %186 = vector.extract_strided_slice %137 {offsets = [1, 0], sizes = [1, 128], strides = [1, 1]} : vector<8x128xf32> to vector<1x128xf32>
    %187 = vector.extract_strided_slice %169 {offsets = [0, 256], sizes = [1, 128], strides = [1, 1]} : vector<1x384xf32> to vector<1x128xf32>
    %188 = arith.addf %187, %139 : vector<1x128xf32>
    %189 = arith.mulf %177, %188 : vector<1x128xf32>
    %190 = arith.addf %186, %189 : vector<1x128xf32>
    %191 = math.tanh %190 : vector<1x128xf32>
    %cst_36 = arith.constant 1.000000e+00 : f32
    %192 = vector.broadcast %cst_36 : f32 to vector<1x128xf32>
    %193 = arith.subf %192, %185 : vector<1x128xf32>
    %194 = arith.mulf %193, %191 : vector<1x128xf32>
    %195 = arith.mulf %185, %168 : vector<1x128xf32>
    %196 = arith.addf %194, %195 : vector<1x128xf32>
    %cst_37 = arith.constant dense<0.000000e+00> : vector<1x384xf32>
    %197 = tpu.matmul %196, %138, %cst_37 {dimension_numbers = #tpu.dot_dimension_numbers<[1], [0], [0], [1], [0, 0, 1, 1], [], []>} : vector<1x128xf32>, vector<128x384xf32>, vector<1x384xf32> -> vector<1x384xf32>
    %198 = vector.extract_strided_slice %135 {offsets = [2, 0], sizes = [1, 128], strides = [1, 1]} : vector<8x128xf32> to vector<1x128xf32>
    %199 = vector.extract_strided_slice %197 {offsets = [0, 0], sizes = [1, 128], strides = [1, 1]} : vector<1x384xf32> to vector<1x128xf32>
    %200 = arith.addf %198, %199 : vector<1x128xf32>
    %201 = arith.negf %200 : vector<1x128xf32>
    %202 = math.exp %201 : vector<1x128xf32>
    %cst_38 = arith.constant 1.000000e+00 : f32
    %203 = vector.broadcast %cst_38 : f32 to vector<1x128xf32>
    %204 = arith.addf %203, %202 : vector<1x128xf32>
    %205 = arith.divf %203, %204 : vector<1x128xf32>
    %206 = vector.extract_strided_slice %136 {offsets = [2, 0], sizes = [1, 128], strides = [1, 1]} : vector<8x128xf32> to vector<1x128xf32>
    %207 = vector.extract_strided_slice %197 {offsets = [0, 128], sizes = [1, 128], strides = [1, 1]} : vector<1x384xf32> to vector<1x128xf32>
    %208 = arith.addf %206, %207 : vector<1x128xf32>
    %209 = arith.negf %208 : vector<1x128xf32>
    %210 = math.exp %209 : vector<1x128xf32>
    %cst_39 = arith.constant 1.000000e+00 : f32
    %211 = vector.broadcast %cst_39 : f32 to vector<1x128xf32>
    %212 = arith.addf %211, %210 : vector<1x128xf32>
    %213 = arith.divf %211, %212 : vector<1x128xf32>
    %214 = vector.extract_strided_slice %137 {offsets = [2, 0], sizes = [1, 128], strides = [1, 1]} : vector<8x128xf32> to vector<1x128xf32>
    %215 = vector.extract_strided_slice %197 {offsets = [0, 256], sizes = [1, 128], strides = [1, 1]} : vector<1x384xf32> to vector<1x128xf32>
    %216 = arith.addf %215, %139 : vector<1x128xf32>
    %217 = arith.mulf %205, %216 : vector<1x128xf32>
    %218 = arith.addf %214, %217 : vector<1x128xf32>
    %219 = math.tanh %218 : vector<1x128xf32>
    %cst_40 = arith.constant 1.000000e+00 : f32
    %220 = vector.broadcast %cst_40 : f32 to vector<1x128xf32>
    %221 = arith.subf %220, %213 : vector<1x128xf32>
    %222 = arith.mulf %221, %219 : vector<1x128xf32>
    %223 = arith.mulf %213, %196 : vector<1x128xf32>
    %224 = arith.addf %222, %223 : vector<1x128xf32>
    %cst_41 = arith.constant dense<0.000000e+00> : vector<1x384xf32>
    %225 = tpu.matmul %224, %138, %cst_41 {dimension_numbers = #tpu.dot_dimension_numbers<[1], [0], [0], [1], [0, 0, 1, 1], [], []>} : vector<1x128xf32>, vector<128x384xf32>, vector<1x384xf32> -> vector<1x384xf32>
    %226 = vector.extract_strided_slice %135 {offsets = [3, 0], sizes = [1, 128], strides = [1, 1]} : vector<8x128xf32> to vector<1x128xf32>
    %227 = vector.extract_strided_slice %225 {offsets = [0, 0], sizes = [1, 128], strides = [1, 1]} : vector<1x384xf32> to vector<1x128xf32>
    %228 = arith.addf %226, %227 : vector<1x128xf32>
    %229 = arith.negf %228 : vector<1x128xf32>
    %230 = math.exp %229 : vector<1x128xf32>
    %cst_42 = arith.constant 1.000000e+00 : f32
    %231 = vector.broadcast %cst_42 : f32 to vector<1x128xf32>
    %232 = arith.addf %231, %230 : vector<1x128xf32>
    %233 = arith.divf %231, %232 : vector<1x128xf32>
    %234 = vector.extract_strided_slice %136 {offsets = [3, 0], sizes = [1, 128], strides = [1, 1]} : vector<8x128xf32> to vector<1x128xf32>
    %235 = vector.extract_strided_slice %225 {offsets = [0, 128], sizes = [1, 128], strides = [1, 1]} : vector<1x384xf32> to vector<1x128xf32>
    %236 = arith.addf %234, %235 : vector<1x128xf32>
    %237 = arith.negf %236 : vector<1x128xf32>
    %238 = math.exp %237 : vector<1x128xf32>
    %cst_43 = arith.constant 1.000000e+00 : f32
    %239 = vector.broadcast %cst_43 : f32 to vector<1x128xf32>
    %240 = arith.addf %239, %238 : vector<1x128xf32>
    %241 = arith.divf %239, %240 : vector<1x128xf32>
    %242 = vector.extract_strided_slice %137 {offsets = [3, 0], sizes = [1, 128], strides = [1, 1]} : vector<8x128xf32> to vector<1x128xf32>
    %243 = vector.extract_strided_slice %225 {offsets = [0, 256], sizes = [1, 128], strides = [1, 1]} : vector<1x384xf32> to vector<1x128xf32>
    %244 = arith.addf %243, %139 : vector<1x128xf32>
    %245 = arith.mulf %233, %244 : vector<1x128xf32>
    %246 = arith.addf %242, %245 : vector<1x128xf32>
    %247 = math.tanh %246 : vector<1x128xf32>
    %cst_44 = arith.constant 1.000000e+00 : f32
    %248 = vector.broadcast %cst_44 : f32 to vector<1x128xf32>
    %249 = arith.subf %248, %241 : vector<1x128xf32>
    %250 = arith.mulf %249, %247 : vector<1x128xf32>
    %251 = arith.mulf %241, %224 : vector<1x128xf32>
    %252 = arith.addf %250, %251 : vector<1x128xf32>
    %cst_45 = arith.constant dense<0.000000e+00> : vector<1x384xf32>
    %253 = tpu.matmul %252, %138, %cst_45 {dimension_numbers = #tpu.dot_dimension_numbers<[1], [0], [0], [1], [0, 0, 1, 1], [], []>} : vector<1x128xf32>, vector<128x384xf32>, vector<1x384xf32> -> vector<1x384xf32>
    %254 = vector.extract_strided_slice %135 {offsets = [4, 0], sizes = [1, 128], strides = [1, 1]} : vector<8x128xf32> to vector<1x128xf32>
    %255 = vector.extract_strided_slice %253 {offsets = [0, 0], sizes = [1, 128], strides = [1, 1]} : vector<1x384xf32> to vector<1x128xf32>
    %256 = arith.addf %254, %255 : vector<1x128xf32>
    %257 = arith.negf %256 : vector<1x128xf32>
    %258 = math.exp %257 : vector<1x128xf32>
    %cst_46 = arith.constant 1.000000e+00 : f32
    %259 = vector.broadcast %cst_46 : f32 to vector<1x128xf32>
    %260 = arith.addf %259, %258 : vector<1x128xf32>
    %261 = arith.divf %259, %260 : vector<1x128xf32>
    %262 = vector.extract_strided_slice %136 {offsets = [4, 0], sizes = [1, 128], strides = [1, 1]} : vector<8x128xf32> to vector<1x128xf32>
    %263 = vector.extract_strided_slice %253 {offsets = [0, 128], sizes = [1, 128], strides = [1, 1]} : vector<1x384xf32> to vector<1x128xf32>
    %264 = arith.addf %262, %263 : vector<1x128xf32>
    %265 = arith.negf %264 : vector<1x128xf32>
    %266 = math.exp %265 : vector<1x128xf32>
    %cst_47 = arith.constant 1.000000e+00 : f32
    %267 = vector.broadcast %cst_47 : f32 to vector<1x128xf32>
    %268 = arith.addf %267, %266 : vector<1x128xf32>
    %269 = arith.divf %267, %268 : vector<1x128xf32>
    %270 = vector.extract_strided_slice %137 {offsets = [4, 0], sizes = [1, 128], strides = [1, 1]} : vector<8x128xf32> to vector<1x128xf32>
    %271 = vector.extract_strided_slice %253 {offsets = [0, 256], sizes = [1, 128], strides = [1, 1]} : vector<1x384xf32> to vector<1x128xf32>
    %272 = arith.addf %271, %139 : vector<1x128xf32>
    %273 = arith.mulf %261, %272 : vector<1x128xf32>
    %274 = arith.addf %270, %273 : vector<1x128xf32>
    %275 = math.tanh %274 : vector<1x128xf32>
    %cst_48 = arith.constant 1.000000e+00 : f32
    %276 = vector.broadcast %cst_48 : f32 to vector<1x128xf32>
    %277 = arith.subf %276, %269 : vector<1x128xf32>
    %278 = arith.mulf %277, %275 : vector<1x128xf32>
    %279 = arith.mulf %269, %252 : vector<1x128xf32>
    %280 = arith.addf %278, %279 : vector<1x128xf32>
    %cst_49 = arith.constant dense<0.000000e+00> : vector<1x384xf32>
    %281 = tpu.matmul %280, %138, %cst_49 {dimension_numbers = #tpu.dot_dimension_numbers<[1], [0], [0], [1], [0, 0, 1, 1], [], []>} : vector<1x128xf32>, vector<128x384xf32>, vector<1x384xf32> -> vector<1x384xf32>
    %282 = vector.extract_strided_slice %135 {offsets = [5, 0], sizes = [1, 128], strides = [1, 1]} : vector<8x128xf32> to vector<1x128xf32>
    %283 = vector.extract_strided_slice %281 {offsets = [0, 0], sizes = [1, 128], strides = [1, 1]} : vector<1x384xf32> to vector<1x128xf32>
    %284 = arith.addf %282, %283 : vector<1x128xf32>
    %285 = arith.negf %284 : vector<1x128xf32>
    %286 = math.exp %285 : vector<1x128xf32>
    %cst_50 = arith.constant 1.000000e+00 : f32
    %287 = vector.broadcast %cst_50 : f32 to vector<1x128xf32>
    %288 = arith.addf %287, %286 : vector<1x128xf32>
    %289 = arith.divf %287, %288 : vector<1x128xf32>
    %290 = vector.extract_strided_slice %136 {offsets = [5, 0], sizes = [1, 128], strides = [1, 1]} : vector<8x128xf32> to vector<1x128xf32>
    %291 = vector.extract_strided_slice %281 {offsets = [0, 128], sizes = [1, 128], strides = [1, 1]} : vector<1x384xf32> to vector<1x128xf32>
    %292 = arith.addf %290, %291 : vector<1x128xf32>
    %293 = arith.negf %292 : vector<1x128xf32>
    %294 = math.exp %293 : vector<1x128xf32>
    %cst_51 = arith.constant 1.000000e+00 : f32
    %295 = vector.broadcast %cst_51 : f32 to vector<1x128xf32>
    %296 = arith.addf %295, %294 : vector<1x128xf32>
    %297 = arith.divf %295, %296 : vector<1x128xf32>
    %298 = vector.extract_strided_slice %137 {offsets = [5, 0], sizes = [1, 128], strides = [1, 1]} : vector<8x128xf32> to vector<1x128xf32>
    %299 = vector.extract_strided_slice %281 {offsets = [0, 256], sizes = [1, 128], strides = [1, 1]} : vector<1x384xf32> to vector<1x128xf32>
    %300 = arith.addf %299, %139 : vector<1x128xf32>
    %301 = arith.mulf %289, %300 : vector<1x128xf32>
    %302 = arith.addf %298, %301 : vector<1x128xf32>
    %303 = math.tanh %302 : vector<1x128xf32>
    %cst_52 = arith.constant 1.000000e+00 : f32
    %304 = vector.broadcast %cst_52 : f32 to vector<1x128xf32>
    %305 = arith.subf %304, %297 : vector<1x128xf32>
    %306 = arith.mulf %305, %303 : vector<1x128xf32>
    %307 = arith.mulf %297, %280 : vector<1x128xf32>
    %308 = arith.addf %306, %307 : vector<1x128xf32>
    %cst_53 = arith.constant dense<0.000000e+00> : vector<1x384xf32>
    %309 = tpu.matmul %308, %138, %cst_53 {dimension_numbers = #tpu.dot_dimension_numbers<[1], [0], [0], [1], [0, 0, 1, 1], [], []>} : vector<1x128xf32>, vector<128x384xf32>, vector<1x384xf32> -> vector<1x384xf32>
    %310 = vector.extract_strided_slice %135 {offsets = [6, 0], sizes = [1, 128], strides = [1, 1]} : vector<8x128xf32> to vector<1x128xf32>
    %311 = vector.extract_strided_slice %309 {offsets = [0, 0], sizes = [1, 128], strides = [1, 1]} : vector<1x384xf32> to vector<1x128xf32>
    %312 = arith.addf %310, %311 : vector<1x128xf32>
    %313 = arith.negf %312 : vector<1x128xf32>
    %314 = math.exp %313 : vector<1x128xf32>
    %cst_54 = arith.constant 1.000000e+00 : f32
    %315 = vector.broadcast %cst_54 : f32 to vector<1x128xf32>
    %316 = arith.addf %315, %314 : vector<1x128xf32>
    %317 = arith.divf %315, %316 : vector<1x128xf32>
    %318 = vector.extract_strided_slice %136 {offsets = [6, 0], sizes = [1, 128], strides = [1, 1]} : vector<8x128xf32> to vector<1x128xf32>
    %319 = vector.extract_strided_slice %309 {offsets = [0, 128], sizes = [1, 128], strides = [1, 1]} : vector<1x384xf32> to vector<1x128xf32>
    %320 = arith.addf %318, %319 : vector<1x128xf32>
    %321 = arith.negf %320 : vector<1x128xf32>
    %322 = math.exp %321 : vector<1x128xf32>
    %cst_55 = arith.constant 1.000000e+00 : f32
    %323 = vector.broadcast %cst_55 : f32 to vector<1x128xf32>
    %324 = arith.addf %323, %322 : vector<1x128xf32>
    %325 = arith.divf %323, %324 : vector<1x128xf32>
    %326 = vector.extract_strided_slice %137 {offsets = [6, 0], sizes = [1, 128], strides = [1, 1]} : vector<8x128xf32> to vector<1x128xf32>
    %327 = vector.extract_strided_slice %309 {offsets = [0, 256], sizes = [1, 128], strides = [1, 1]} : vector<1x384xf32> to vector<1x128xf32>
    %328 = arith.addf %327, %139 : vector<1x128xf32>
    %329 = arith.mulf %317, %328 : vector<1x128xf32>
    %330 = arith.addf %326, %329 : vector<1x128xf32>
    %331 = math.tanh %330 : vector<1x128xf32>
    %cst_56 = arith.constant 1.000000e+00 : f32
    %332 = vector.broadcast %cst_56 : f32 to vector<1x128xf32>
    %333 = arith.subf %332, %325 : vector<1x128xf32>
    %334 = arith.mulf %333, %331 : vector<1x128xf32>
    %335 = arith.mulf %325, %308 : vector<1x128xf32>
    %336 = arith.addf %334, %335 : vector<1x128xf32>
    %cst_57 = arith.constant dense<0.000000e+00> : vector<1x384xf32>
    %337 = tpu.matmul %336, %138, %cst_57 {dimension_numbers = #tpu.dot_dimension_numbers<[1], [0], [0], [1], [0, 0, 1, 1], [], []>} : vector<1x128xf32>, vector<128x384xf32>, vector<1x384xf32> -> vector<1x384xf32>
    %338 = vector.extract_strided_slice %135 {offsets = [7, 0], sizes = [1, 128], strides = [1, 1]} : vector<8x128xf32> to vector<1x128xf32>
    %339 = vector.extract_strided_slice %337 {offsets = [0, 0], sizes = [1, 128], strides = [1, 1]} : vector<1x384xf32> to vector<1x128xf32>
    %340 = arith.addf %338, %339 : vector<1x128xf32>
    %341 = arith.negf %340 : vector<1x128xf32>
    %342 = math.exp %341 : vector<1x128xf32>
    %cst_58 = arith.constant 1.000000e+00 : f32
    %343 = vector.broadcast %cst_58 : f32 to vector<1x128xf32>
    %344 = arith.addf %343, %342 : vector<1x128xf32>
    %345 = arith.divf %343, %344 : vector<1x128xf32>
    %346 = vector.extract_strided_slice %136 {offsets = [7, 0], sizes = [1, 128], strides = [1, 1]} : vector<8x128xf32> to vector<1x128xf32>
    %347 = vector.extract_strided_slice %337 {offsets = [0, 128], sizes = [1, 128], strides = [1, 1]} : vector<1x384xf32> to vector<1x128xf32>
    %348 = arith.addf %346, %347 : vector<1x128xf32>
    %349 = arith.negf %348 : vector<1x128xf32>
    %350 = math.exp %349 : vector<1x128xf32>
    %cst_59 = arith.constant 1.000000e+00 : f32
    %351 = vector.broadcast %cst_59 : f32 to vector<1x128xf32>
    %352 = arith.addf %351, %350 : vector<1x128xf32>
    %353 = arith.divf %351, %352 : vector<1x128xf32>
    %354 = vector.extract_strided_slice %137 {offsets = [7, 0], sizes = [1, 128], strides = [1, 1]} : vector<8x128xf32> to vector<1x128xf32>
    %355 = vector.extract_strided_slice %337 {offsets = [0, 256], sizes = [1, 128], strides = [1, 1]} : vector<1x384xf32> to vector<1x128xf32>
    %356 = arith.addf %355, %139 : vector<1x128xf32>
    %357 = arith.mulf %345, %356 : vector<1x128xf32>
    %358 = arith.addf %354, %357 : vector<1x128xf32>
    %359 = math.tanh %358 : vector<1x128xf32>
    %cst_60 = arith.constant 1.000000e+00 : f32
    %360 = vector.broadcast %cst_60 : f32 to vector<1x128xf32>
    %361 = arith.subf %360, %353 : vector<1x128xf32>
    %362 = arith.mulf %361, %359 : vector<1x128xf32>
    %363 = arith.mulf %353, %336 : vector<1x128xf32>
    %364 = arith.addf %362, %363 : vector<1x128xf32>
    %365 = tpu.concatenate %168, %196, %224, %252, %280, %308, %336, %364 in 0 : vector<1x128xf32>, vector<1x128xf32>, vector<1x128xf32>, vector<1x128xf32>, vector<1x128xf32>, vector<1x128xf32>, vector<1x128xf32>, vector<1x128xf32> -> vector<8x128xf32>
    %366 = vector.extract_strided_slice %365 {offsets = [0, 0], sizes = [8, 32], strides = [1, 1]} : vector<8x128xf32> to vector<8x32xf32>
    %c0_61 = arith.constant 0 : index
    %c0_62 = arith.constant 0 : index
    %367 = vector.load %arg7[%c0_61, %c0_62] : memref<8x32xf32, #tpu.memory_space<vmem>>, vector<8x32xf32>
    tpu.vector_store %arg7[%c0_61, %c0_62], %366 {strides = array<i32>} : memref<8x32xf32, #tpu.memory_space<vmem>>, vector<8x32xf32>,
    return
  }
}

</mosaic_0001>

<bundles_post_ra>
// kernel: tpu_custom_call.1
= control target key start
LH: loop header
LB: loop body
LE: loop exit
PB: predicated region body
PF: predicated region fallthrough
CT: control target
= control target key end

     0   :  { %12 = vsyncpa [#allocation3], 0  ;;  %s3605_s0 = inlined_call_operand.vmem [shape: s32[8,1], index: 0, kind: input, shape index: {}]   ;;  %s3606_s1 = inlined_call_operand.hbm [shape: f32[16,32], index: 1, kind: input, shape index: {}]   ;;  %s3607_s2 = inlined_call_operand.hbm [shape: f32[32,384], index: 2, kind: input, shape index: {}]   ;;  %s3608_s3 = inlined_call_operand.hbm [shape: f32[128,384], index: 3, kind: input, shape index: {}]   ;;  %s3609_s4 = inlined_call_operand.vmem [shape: f32[1,384], index: 4, kind: input, shape index: {}]   ;;  %s3610_s5 = inlined_call_operand.vmem [shape: f32[1,128], index: 5, kind: input, shape index: {}]   ;;  %s3611_s6 = inlined_call_operand.vmem [shape: f32[1,128], index: 6, kind: input, shape index: {}]   ;;  %s3612_s7 = inlined_call_operand.hbm [shape: f32[8,32], index: 7, kind: output, shape index: {}]  }
   0x1   :  { %13 = vsyncpa [#allocation6], 0 }
   0x2   :  { %14 = vsyncpa [#allocation4], 0  ;;  %s3032_s24 = smov [#allocation5]   ;;  %s2938_s28 = scalar_lea.hbm %s3607_s2, 1536 }
   0x3   :  { %s34_s25 = sshll.u32 %s3032_s24, 4  ;;  %p2939_p0 = scmp.ne.s32.totalorder %s3607_s2, %s2938_s28  ;;  %s35_s25 = int_to_ptr.vmem [resolvable:$true] %s34_s25 }
   0x4   :  { %p2942_p1 = scmp.lt.u32.totalorder %s2938_s28, %s3607_s2 }
   0x6   :  { %p2944_p2 = pnand %p2942_p1, %p2939_p0 }
   0x8   :  { %2947 = shalt.err (!%p2944_p2)
}
   0x9   :  { %s2948_s10 = scalar_lea.vmem %s35_s25, 1536  ;;  %p2953_p4 = scmp.lt.s32.totalorder %s35_s25, %s35_s25 }
   0xa   :  { %p2949_p3 = scmp.ne.s32.totalorder %s35_s25, %s2948_s10  ;;  %p2954_p5 = scmp.lt.s32.totalorder %s2948_s10, %s2948_s10 }
   0xc   :  { %p2955_p6 = por %p2954_p5, %p2953_p4 }
   0xe   :  { %p2956_p7 = pnand %p2955_p6, %p2949_p3 }
  0x10   :  { %2959 = shalt.err (!%p2956_p7)
}
  0x11   :  { %s3033_s11 = smov 384   ;;  %s3034_s12 = smov 24  }
  0x12   :  { %40 = dma.hbm_to_vmem [thread:$0]  %s3607_s2, 1536, %s35_s25, [#allocation6], %s3033_s11, %s3033_s11, %s3034_s12  }
  0x13   :  { %s3035_s15 = smov [#allocation2]   ;;  %s2960_s19 = scalar_lea.hbm %s3606_s1, 256 }
  0x14   :  { %s22_s16 = sshll.u32 %s3035_s15, 4  ;;  %p2961_p8 = scmp.ne.s32.totalorder %s3606_s1, %s2960_s19  ;;  %s23_s16 = int_to_ptr.vmem [resolvable:$true] %s22_s16 }
  0x15   :  { %p2964_p9 = scmp.lt.u32.totalorder %s2960_s19, %s3606_s1 }
  0x17   :  { %p2966_p10 = pnand %p2964_p9, %p2961_p8 }
  0x19   :  { %2969 = shalt.err (!%p2966_p10)
}
  0x1a   :  { %s2970_s24 = scalar_lea.vmem %s23_s16, 256  ;;  %p2975_p12 = scmp.lt.s32.totalorder %s23_s16, %s23_s16 }
  0x1b   :  { %p2971_p11 = scmp.ne.s32.totalorder %s23_s16, %s2970_s24  ;;  %p2976_p13 = scmp.lt.s32.totalorder %s2970_s24, %s2970_s24 }
  0x1d   :  { %p2977_p0 = por %p2976_p13, %p2975_p12 }
  0x1f   :  { %p2978_p1 = pnand %p2977_p0, %p2971_p11 }
  0x21   :  { %2981 = shalt.err (!%p2978_p1)
}
  0x22   :  { %s3036_s2 = smov 128   ;;  %s3037_s25 = smov 8  }
  0x23   :  { %28 = dma.hbm_to_vmem [thread:$0]  %s3606_s1, 256, %s23_s16, [#allocation3], %s3036_s2, %s3036_s2, %s3037_s25  }
  0x24   :  { %s3038_s28 = smov [#allocation7]   ;;  %s2982_s9 = scalar_lea.hbm %s3608_s3, 6144 }
  0x25   :  { %s46_s29 = sshll.u32 %s3038_s28, 4  ;;  %p2983_p2 = scmp.ne.s32.totalorder %s3608_s3, %s2982_s9  ;;  %s47_s29 = int_to_ptr.vmem [resolvable:$true] %s46_s29 }
  0x26   :  { %p2986_p3 = scmp.lt.u32.totalorder %s2982_s9, %s3608_s3 }
  0x28   :  { %p2988_p4 = pnand %p2986_p3, %p2983_p2 }
  0x2a   :  { %2991 = shalt.err (!%p2988_p4)
}
  0x2b   :  { %s2992_s17 = scalar_lea.vmem %s47_s29, 6144  ;;  %p2997_p6 = scmp.lt.s32.totalorder %s47_s29, %s47_s29 }
  0x2c   :  { %p2993_p5 = scmp.ne.s32.totalorder %s47_s29, %s2992_s17  ;;  %p2998_p7 = scmp.lt.s32.totalorder %s2992_s17, %s2992_s17 }
  0x2e   :  { %p2999_p8 = por %p2998_p7, %p2997_p6 }
  0x30   :  { %p3000_p9 = pnand %p2999_p8, %p2993_p5 }
  0x32   :  { %3003 = shalt.err (!%p3000_p9)
}
  0x33   :  { %52 = dma.hbm_to_vmem [thread:$0]  %s3608_s3, 6144, %s47_s29, [#allocation6], %s3033_s11, %s3033_s11, %s3034_s12  }
  0x34   :  { %3026 = dma.done.wait [#allocation3], 256  }
  0x35   :  { %3027 = vsyncadd [#allocation3], 4294967040 }
  0x36   :  { %3028 = dma.done.wait [#allocation6], 7680  }
  0x37   :  { %3029 = vsyncadd [#allocation6], 4294959616  ;;  %v3039_v0 = vmov 0   ;;  %v3131_v1 = vld [vmem:[%s3605_s0] sm:$0xff]  ;;  %v262_v14 = vld [vmem:[#allocation5 + $0x8] sm:$0xff]  ;;  %v3040_v24 = vmov 0.0|0.0  }
  0x38   :  { %2857 = vset.pattern.permute.xlu1 %v3039_v0  ;;  %2856 = vset.pattern.permute.xlu0 %v3039_v0  ;;  %vm93_vm0 = vcmp.eq.s32.totalorder %v3131_v1, 2  ;;  %vm69_vm1 = vcmp.eq.s32.totalorder %v3131_v1, 0  ;;  %vm105_vm2 = vcmp.eq.s32.totalorder %v3131_v1, 3  ;;  %vm81_vm3 = vcmp.eq.s32.totalorder %v3131_v1, 1  ;;  %v265_v15 = vld [vmem:[#allocation5 + $0x20] sm:$0xff]  ;;  %v264_v18 = vld [vmem:[#allocation5 + $0x18] sm:$0xff] }
  0x39   :  { %v95_v2 = vsel %vm93_vm0, 1, %v3039_v0  ;;  %v71_v3 = vsel %vm69_vm1, 1, %v3039_v0  ;;  %v107_v4 = vsel %vm105_vm2, 1, %v3039_v0  ;;  %v83_v5 = vsel %vm81_vm3, 1, %v3039_v0  ;;  %v261_v17 = vld [vmem:[#allocation5] sm:$0xff]  ;;  %v263_v22 = vld [vmem:[#allocation5 + $0x10] sm:$0xff]  ;;  %2390 = vmatprep.subr.bf16.mxu1 %v3040_v24 }
  0x3a   :  { %97 = vperm.xlu1 %2857, %v95_v2   ;;  %73 = vperm.xlu0 %2856, %v71_v3   ;;  %vm129_vm4 = vcmp.eq.s32.totalorder %v3131_v1, 5  ;;  %vm117_vm5 = vcmp.eq.s32.totalorder %v3131_v1, 4  ;;  %vm153_vm6 = vcmp.eq.s32.totalorder %v3131_v1, 7  ;;  %vm141_vm7 = vcmp.eq.s32.totalorder %v3131_v1, 6  ;;  %v266_v23 = vld [vmem:[#allocation5 + $0x28] sm:$0xff]  ;;  %v268_v26 = vld [vmem:[#allocation5 + $0x38] sm:$0xff] }
  0x3b   :  { %v131_v6 = vsel %vm129_vm4, 1, %v3039_v0  ;;  %v119_v7 = vsel %vm117_vm5, 1, %v3039_v0  ;;  %v155_v8 = vsel %vm153_vm6, 1, %v3039_v0  ;;  %v143_v9 = vsel %vm141_vm7, 1, %v3039_v0  ;;  %v271_v27 = vld [vmem:[#allocation5 + $0x50] sm:$0xff]  ;;  %v270_v30 = vld [vmem:[#allocation5 + $0x48] sm:$0xff] }
  0x3c   :  { %vm177_vm8 = vcmp.eq.s32.totalorder %v3131_v1, 9  ;;  %vm165_vm9 = vcmp.eq.s32.totalorder %v3131_v1, 8  ;;  %vm201_vm10 = vcmp.eq.s32.totalorder %v3131_v1, 11  ;;  %vm189_vm11 = vcmp.eq.s32.totalorder %v3131_v1, 10  ;;  %v267_v29 = vld [vmem:[#allocation5 + $0x30] sm:$0xff]  ;;  %v269_v34 = vld [vmem:[#allocation5 + $0x40] sm:$0xff] }
  0x3d   :  { %v179_v10 = vsel %vm177_vm8, 1, %v3039_v0  ;;  %v167_v11 = vsel %vm165_vm9, 1, %v3039_v0  ;;  %v203_v12 = vsel %vm201_vm10, 1, %v3039_v0  ;;  %v191_v13 = vsel %vm189_vm11, 1, %v3039_v0  ;;  %v272_v35 = vld [vmem:[#allocation5 + $0x58] sm:$0xff]  ;;  %v436_v37 = vld [vmem:[#allocation7 + $0x8] sm:$0xff] }
  0x3e   :  { %109 = vperm.xlu1 %2857, %v107_v4   ;;  %85 = vperm.xlu0 %2856, %v83_v5   ;;  %vm225_vm12 = vcmp.eq.s32.totalorder %v3131_v1, 13  ;;  %vm213_vm13 = vcmp.eq.s32.totalorder %v3131_v1, 12  ;;  %v2382_v16 = vpack.c.bf16 %v265_v15, %v262_v14  ;;  %v2384_v21 = vpack.c.bf16 %v264_v18, %v261_v17  ;;  %v439_v38 = vld [vmem:[#allocation7 + $0x20] sm:$0xff]  ;;  %v1916_v43 = vld [vmem:[#allocation2] ss:$0 sm:$0xff]  ;;  %v438_v17 = vld [vmem:[#allocation7 + $0x18] sm:$0xff] }
  0x3f   :  { %v227_v19 = vsel %vm225_vm12, 1, %v3039_v0  ;;  %v215_v20 = vsel %vm213_vm13, 1, %v3039_v0  ;;  %vm249_vm14 = vcmp.eq.s32.totalorder %v3131_v1, 15  ;;  %vm237_vm15 = vcmp.eq.s32.totalorder %v3131_v1, 14  ;;  %v1917_v44 = vld [vmem:[#allocation2 + $0x1] ss:$0 sm:$0xff] }
  0x40   :  { %2383 = vmatprep.subr.bf16.mxu0 %v2382_v16  ;;  %v2391_v25 = vpack.c.bf16 %v266_v23, %v263_v22  ;;  %v2386_v28 = vpack.c.bf16 %v271_v27, %v268_v26  ;;  %v251_v31 = vsel %vm249_vm14, 1, %v3039_v0  ;;  %v239_v32 = vsel %vm237_vm15, 1, %v3039_v0  ;;  %v1918_v46 = vld [vmem:[#allocation2 + $0x2] ss:$0 sm:$0xff]  ;;  %v1919_v49 = vld [vmem:[#allocation2 + $0x3] ss:$0 sm:$0xff] }
  0x41   :  { %2385 = vmatpush1.bf16.msra.mxu0 %v2384_v21  ;;  %v2388_v33 = vpack.c.bf16 %v270_v30, %v267_v29  ;;  %v2394_v36 = vpack.c.bf16 %v272_v35, %v269_v34  ;;  %v3167_v39 = vpack.c.bf16 %v439_v38, %v436_v37  ;;  %v3041_v40 = vmov 0.0   ;;  %v1920_v52 = vld [vmem:[#allocation2 + $0x4] ss:$0 sm:$0xff]  ;;  %v1921_v57 = vld [vmem:[#allocation2 + $0x5] ss:$0 sm:$0xff]  ;;  %v435_v16 = vld [vmem:[#allocation7] sm:$0xff] }
  0x42   :  { %133 = vperm.xlu1 %2857, %v131_v6   ;;  %121 = vperm.xlu0 %2856, %v119_v7   ;;  %vm3042_vm0 = vmmov 0   ;;  %v1922_v58 = vld [vmem:[#allocation2 + $0x6] ss:$0 sm:$0xff]  ;;  %v1923_v63 = vld [vmem:[#allocation2 + $0x7] ss:$0 sm:$0xff]  ;;  %v440_v21 = vld [vmem:[#allocation7 + $0x28] sm:$0xff]  ;;  %v3174_v29 = vpack.c.bf16 %v438_v17, %v435_v16 }
  0x43   :  { %2392 = vmatpush3.bf16.msra.mxu1 %v2391_v25  ;;  %2387 = vmatprep.subr.bf16.mxu0 %v2386_v28  ;;  %v1924_v0 = vld [vmem:[#allocation2 + $0x8] ss:$0 sm:$0xff]  ;;  %v1925_v5 = vld [vmem:[#allocation2 + $0x9] ss:$0 sm:$0xff]  ;;  %v1926_v6 = vld [vmem:[#allocation2 + $0xa] ss:$0 sm:$0xff] }
  0x44   :  { %2393 = vmatprep.subr.bf16.mxu1 %v3040_v24  ;;  %358 = vmatprep.mubr.f32.mxu0 %v3041_v40  ;;  %v1930_v22 = vld [vmem:[#allocation2 + $0xe] ss:$0 sm:$0xff]  ;;  %v445_v25 = vld [vmem:[#allocation7 + $0x50] sm:$0xff]  ;;  %v1931_v28 = vld [vmem:[#allocation2 + $0xf] ss:$0 sm:$0xff]  ;;  %vm290_vm15 = vcmask 261120  }
  0x45   :  { %2389 = vmatpush1.bf16.msra.mxu0 %v2388_v33  ;;  %2099 = vmatprep.mubr.msk.f32.mxu1 %vm3042_vm0, %v3041_v40  ;;  %v442_v23 = vld [vmem:[#allocation7 + $0x38] sm:$0xff]  ;;  %v444_v35 = vld [vmem:[#allocation7 + $0x48] sm:$0xff]  ;;  %v471_v16 = vld [vmem:[#allocation7 + $0x120] sm:$0xff] }
  0x46   :  { %157 = vperm.xlu1 %2857, %v155_v8   ;;  %145 = vperm.xlu0 %2856, %v143_v9   ;;  %v3178_v34 = vpack.c.bf16 %v445_v25, %v442_v23  ;;  %v446_v37 = vld [vmem:[#allocation7 + $0x58] sm:$0xff]  ;;  %v481_v23 = vld [vmem:[#allocation7 + $0x170] sm:$0xff] }
  0x47   :  { %2395 = vmatpush3.bf16.msra.mxu1 %v2394_v36  ;;  %2397 = vmatprep.subr.bf16.mxu0 %v3167_v39  ;;  %v443_v36 = vld [vmem:[#allocation7 + $0x40] sm:$0xff] }
  0x48   :  { %2428 = vmatprep.subr.bf16.mxu1 %v3040_v24 }
  0x4a   :  { %181 = vperm.xlu1 %2857, %v179_v10   ;;  %169 = vperm.xlu0 %2856, %v167_v11   ;;  %v1927_v11 = vld [vmem:[#allocation2 + $0xb] ss:$0 sm:$0xff] }
  0x4e   :  { %205 = vperm.xlu1 %2857, %v203_v12   ;;  %193 = vperm.xlu0 %2856, %v191_v13   ;;  %v1928_v12 = vld [vmem:[#allocation2 + $0xc] ss:$0 sm:$0xff] }
  0x52   :  { %229 = vperm.xlu1 %2857, %v227_v19   ;;  %217 = vperm.xlu0 %2856, %v215_v20   ;;  %v1929_v19 = vld [vmem:[#allocation2 + $0xd] ss:$0 sm:$0xff]  ;;  %v437_v20 = vld [vmem:[#allocation7 + $0x10] sm:$0xff] }
  0x56   :  { %253 = vperm.xlu1 %2857, %v251_v31   ;;  %241 = vperm.xlu0 %2856, %v239_v32   ;;  %v441_v31 = vld [vmem:[#allocation7 + $0x30] sm:$0xff]  ;;  %v3176_v32 = vpack.c.bf16 %v440_v21, %v437_v20  ;;  %v476_v21 = vld [vmem:[#allocation7 + $0x148] sm:$0xff] }
  0x57   :  { %v473_v20 = vld [vmem:[#allocation7 + $0x130] sm:$0xff] }
  0xb9   :  { %v98_v41 = vpop.permute.xlu1 %97  ;;  %v74_v42 = vpop.permute.xlu0 %73 }
  0xba   :  { %vm75_vm1 = vcmp.eq.s32.totalorder %v74_v42, 1  ;;  %vm99_vm3 = vcmp.eq.s32.totalorder %v98_v41, 1  ;;  %v448_v41 = vld [vmem:[#allocation7 + $0x68] sm:$0xff]  ;;  %v451_v42 = vld [vmem:[#allocation7 + $0x80] sm:$0xff] }
  0xbb   :  { %v80_v48 = vsel %vm75_vm1, %v1916_v43, 0.0  ;;  %v3183_v43 = vpack.c.bf16 %v444_v35, %v441_v31  ;;  %v479_v31 = vld [vmem:[#allocation7 + $0x160] sm:$0xff] }
  0xbd   :  { %v110_v45 = vpop.permute.xlu1 %109  ;;  %v86_v47 = vpop.permute.xlu0 %85 }
  0xbe   :  { %vm87_vm2 = vcmp.eq.s32.totalorder %v86_v47, 1  ;;  %vm111_vm4 = vcmp.eq.s32.totalorder %v110_v45, 1  ;;  %v3186_v45 = vpack.c.bf16 %v446_v37, %v443_v36  ;;  %v450_v47 = vld [vmem:[#allocation7 + $0x78] sm:$0xff]  ;;  %v3257_v37 = vld [vmem:[%s3611_s6] sm:$0x1] }
  0xbf   :  { %v92_v50 = vsel %vm87_vm2, %v1917_v44, %v80_v48  ;;  %v447_v44 = vld [vmem:[#allocation7 + $0x60] sm:$0xff]  ;;  %v449_v48 = vld [vmem:[#allocation7 + $0x70] sm:$0xff] }
  0xc0   :  { %v104_v51 = vsel %vm99_vm3, %v1918_v46, %v92_v50  ;;  %v3189_v46 = vpack.c.bf16 %v451_v42, %v448_v41  ;;  %v454_v50 = vld [vmem:[#allocation7 + $0x98] sm:$0xff]  ;;  %vm1885_vm3 = vcmask 1040384  }
  0xc1   :  { %v134_v53 = vpop.permute.xlu1 %133  ;;  %v116_v54 = vsel %vm111_vm4, %v1919_v49, %v104_v51  ;;  %v122_v55 = vpop.permute.xlu0 %121  ;;  %v452_v49 = vld [vmem:[#allocation7 + $0x88] sm:$0xff]  ;;  %v457_v51 = vld [vmem:[#allocation7 + $0xb0] sm:$0xff]  ;;  %vm1887_vm4 = vcmask 1041408  }
  0xc2   :  { %vm123_vm5 = vcmp.eq.s32.totalorder %v122_v55, 1  ;;  %vm135_vm6 = vcmp.eq.s32.totalorder %v134_v53, 1  ;;  %v453_v53 = vld [vmem:[#allocation7 + $0x90] sm:$0xff]  ;;  %v3202_v55 = vpack.c.bf16 %v457_v51, %v454_v50 }
  0xc3   :  { %v128_v56 = vsel %vm123_vm5, %v1920_v52, %v116_v54  ;;  %v3196_v52 = vpack.c.bf16 %v450_v47, %v447_v44  ;;  %v3199_v54 = vpack.c.bf16 %v452_v49, %v449_v48  ;;  %v275_v47 = vlaneseq  ;;  %v273_v50 = vld [vmem:[%s3609_s4] sm:$0x7] }
  0xc4   :  { %v140_v61 = vsel %vm135_vm6, %v1921_v57, %v128_v56  ;;  %v456_v56 = vld [vmem:[#allocation7 + $0xa8] sm:$0xff]  ;;  %v455_v57 = vld [vmem:[#allocation7 + $0xa0] sm:$0xff]  ;;  %vm1889_vm5 = vcmask 1042432   ;;  %vm1891_vm6 = vcmask 1043456  }
  0xc5   :  { %v158_v59 = vpop.permute.xlu1 %157  ;;  %v146_v60 = vpop.permute.xlu0 %145  ;;  %v276_v48 = vshrl.u32 %v275_v47, 7 }
  0xc6   :  { %vm147_vm7 = vcmp.eq.s32.totalorder %v146_v60, 1  ;;  %vm159_vm8 = vcmp.eq.s32.totalorder %v158_v59, 1  ;;  %v460_v59 = vld [vmem:[#allocation7 + $0xc8] sm:$0xff]  ;;  %v463_v60 = vld [vmem:[#allocation7 + $0xe0] sm:$0xff] }
  0xc7   :  { %v152_v62 = vsel %vm147_vm7, %v1922_v58, %v140_v61  ;;  %v458_v58 = vld [vmem:[#allocation7 + $0xb8] sm:$0xff]  ;;  %v3206_v61 = vpack.c.bf16 %v456_v56, %v453_v53  ;;  %v277_v49 = vsub.s32 0, %v276_v48  ;;  %v281_v51 = vsub.s32 1, %v276_v48 }
  0xc8   :  { %v164_v3 = vsel %vm159_vm8, %v1923_v63, %v152_v62  ;;  %v459_v62 = vld [vmem:[#allocation7 + $0xc0] sm:$0xff]  ;;  %v3209_v63 = vpack.c.bf16 %v458_v58, %v455_v57  ;;  %vm1893_vm7 = vcmask 1044480   ;;  %vm1897_vm8 = vcmask 1046528  }
  0xc9   :  { %v182_v1 = vpop.permute.xlu1 %181  ;;  %v170_v2 = vpop.permute.xlu0 %169  ;;  %v278_v53 = vrot.slane %v273_v50, %v277_v49  ;;  %v282_v56 = vrot.slane %v273_v50, %v281_v51 }
  0xca   :  { %vm171_vm9 = vcmp.eq.s32.totalorder %v170_v2, 1  ;;  %vm183_vm10 = vcmp.eq.s32.totalorder %v182_v1, 1  ;;  %v462_v1 = vld [vmem:[#allocation7 + $0xd8] sm:$0xff]  ;;  %v461_v2 = vld [vmem:[#allocation7 + $0xd0] sm:$0xff] }
  0xcb   :  { %v176_v4 = vsel %vm171_vm9, %v1924_v0, %v164_v3  ;;  %v3212_v0 = vpack.c.bf16 %v463_v60, %v460_v59  ;;  %v464_v3 = vld [vmem:[#allocation7 + $0xe8] sm:$0xff] }
  0xcc   :  { %v188_v9 = vsel %vm183_vm10, %v1925_v5, %v176_v4  ;;  %v466_v4 = vld [vmem:[#allocation7 + $0xf8] sm:$0xff]  ;;  %v469_v5 = vld [vmem:[#allocation7 + $0x110] sm:$0xff] }
  0xcd   :  { %v206_v7 = vpop.permute.xlu1 %205  ;;  %v194_v8 = vpop.permute.xlu0 %193 }
  0xce   :  { %vm195_vm11 = vcmp.eq.s32.totalorder %v194_v8, 1  ;;  %vm207_vm12 = vcmp.eq.s32.totalorder %v206_v7, 1  ;;  %v465_v7 = vld [vmem:[#allocation7 + $0xf0] sm:$0xff]  ;;  %v3219_v8 = vpack.c.bf16 %v464_v3, %v461_v2 }
  0xcf   :  { %v200_v10 = vsel %vm195_vm11, %v1926_v6, %v188_v9  ;;  %v3216_v6 = vpack.c.bf16 %v462_v1, %v459_v62  ;;  %v3222_v9 = vpack.c.bf16 %v469_v5, %v466_v4 }
  0xd0   :  { %v212_v15 = vsel %vm207_vm12, %v1927_v11, %v200_v10  ;;  %v468_v10 = vld [vmem:[#allocation7 + $0x108] sm:$0xff]  ;;  %v467_v11 = vld [vmem:[#allocation7 + $0x100] sm:$0xff] }
  0xd1   :  { %v230_v13 = vpop.permute.xlu1 %229  ;;  %v218_v14 = vpop.permute.xlu0 %217 }
  0xd2   :  { %vm219_vm13 = vcmp.eq.s32.totalorder %v218_v14, 1  ;;  %vm231_vm14 = vcmp.eq.s32.totalorder %v230_v13, 1  ;;  %v472_v13 = vld [vmem:[#allocation7 + $0x128] sm:$0xff]  ;;  %v475_v14 = vld [vmem:[#allocation7 + $0x140] sm:$0xff] }
  0xd3   :  { %v224_v18 = vsel %vm219_vm13, %v1928_v12, %v212_v15  ;;  %v470_v12 = vld [vmem:[#allocation7 + $0x118] sm:$0xff]  ;;  %v3226_v15 = vpack.c.bf16 %v468_v10, %v465_v7 }
  0xd4   :  { %v236_v30 = vsel %vm231_vm14, %v1929_v19, %v224_v18  ;;  %v3229_v17 = vpack.c.bf16 %v470_v12, %v467_v11  ;;  %v3232_v18 = vpack.c.bf16 %v475_v14, %v472_v13  ;;  %v474_v19 = vld [vmem:[#allocation7 + $0x138] sm:$0xff]  ;;  %v285_v11 = vsub.s32 2, %v276_v48  ;;  %v3311_v13 = vld [vmem:[%s3610_s5] sm:$0x1]  ;;  %s3043_s5 = smov [#allocation8]  }
  0xd5   :  { %v254_v26 = vpop.permute.xlu1 %253  ;;  %v242_v27 = vpop.permute.xlu0 %241  ;;  %v3236_v25 = vpack.c.bf16 %v474_v19, %v471_v16  ;;  %s1906_s20 = sshll.u32 %s3043_s5, 4  ;;  %s1907_s20 = int_to_ptr.vmem [resolvable:$true] %s1906_s20 }
  0xd6   :  { %vm255_vm1 = vcmp.eq.s32.totalorder %v254_v26, 1  ;;  %vm243_vm2 = vcmp.eq.s32.totalorder %v242_v27, 1  ;;  %v477_v26 = vld [vmem:[#allocation7 + $0x150] sm:$0xff]  ;;  %v3239_v27 = vpack.c.bf16 %v476_v21, %v473_v20  ;;  %v286_v14 = vrot.slane %v273_v50, %v285_v11  ;;  %s3004_s21 = scalar_lea.vmem %s1907_s20, 128  ;;  %p3009_p11 = scmp.lt.s32.totalorder %s1907_s20, %s1907_s20 }
  0xd7   :  { %v248_v33 = vsel %vm243_vm2, %v1930_v22, %v236_v30  ;;  %v478_v22 = vld [vmem:[#allocation7 + $0x158] sm:$0xff]  ;;  %v480_v30 = vld [vmem:[#allocation7 + $0x168] sm:$0xff]  ;;  %p3005_p10 = scmp.ne.s32.totalorder %s1907_s20, %s3004_s21  ;;  %p3010_p12 = scmp.lt.s32.totalorder %s3004_s21, %s3004_s21 }
  0xd8   :  { %v260_v38 = vsel %vm255_vm1, %v1931_v28, %v248_v33  ;;  %v3242_v28 = vpack.c.bf16 %v481_v23, %v478_v22  ;;  %v482_v33 = vld [vmem:[#allocation7 + $0x178] sm:$0xff]  ;;  %v3246_v35 = vpack.c.bf16 %v480_v30, %v477_v26 }
  0xd9   :  { %1932 = vmatmul.mubr.msk.f32.vlgmr.msra.gmra.mrb[0].mxu0 %vm290_vm15, %v260_v38  ;;  %2100 = vmatmul.mubr.msk.f32.vlgmr.msra.gmra.mrb[0].mxu1 %vm290_vm15, %v260_v38  ;;  %v3249_v36 = vpack.c.bf16 %v482_v33, %v479_v31  ;;  %p3011_p13 = por %p3010_p12, %p3009_p11 }
  0xda   :  { %2399 = vmatpush1.bf16.msra.mxu0 %v3174_v29  ;;  %2430 = vmatpush3.bf16.msra.mxu1 %v3176_v32 }
  0xdb   :  { %2401 = vmatprep.subr.bf16.mxu0 %v3178_v34  ;;  %2431 = vmatprep.subr.bf16.mxu1 %v3040_v24  ;;  %p3012_p0 = pnand %p3011_p13, %p3005_p10 }
  0xdc   :  { %549 = vmatprep.mubr.f32.mxu0 %v3041_v40  ;;  %2134 = vmatprep.mubr.msk.f32.mxu1 %vm3042_vm0, %v3041_v40 }
  0xde   :  { %2403 = vmatpush1.bf16.msra.mxu0 %v3183_v43  ;;  %2433 = vmatpush3.bf16.msra.mxu1 %v3186_v45 }
  0xdf   :  { %2405 = vmatprep.subr.bf16.mxu0 %v3189_v46  ;;  %2434 = vmatprep.subr.bf16.mxu1 %v3040_v24 }
  0xe2   :  { %2407 = vmatpush1.bf16.msra.mxu0 %v3196_v52  ;;  %2436 = vmatpush3.bf16.msra.mxu1 %v3199_v54 }
  0xe3   :  { %2409 = vmatprep.subr.bf16.mxu0 %v3202_v55  ;;  %2437 = vmatprep.subr.bf16.mxu1 %v3040_v24 }
  0xe6   :  { %2411 = vmatpush1.bf16.msra.mxu0 %v3206_v61  ;;  %2439 = vmatpush3.bf16.msra.mxu1 %v3209_v63 }
  0xe7   :  { %2413 = vmatprep.subr.bf16.mxu0 %v3212_v0  ;;  %2440 = vmatprep.subr.bf16.mxu1 %v3040_v24 }
  0xea   :  { %2415 = vmatpush1.bf16.msra.mxu0 %v3216_v6  ;;  %2442 = vmatpush3.bf16.msra.mxu1 %v3219_v8 }
  0xeb   :  { %2417 = vmatprep.subr.bf16.mxu0 %v3222_v9  ;;  %2443 = vmatprep.subr.bf16.mxu1 %v3040_v24 }
  0xee   :  { %2419 = vmatpush1.bf16.msra.mxu0 %v3226_v15  ;;  %2445 = vmatpush3.bf16.msra.mxu1 %v3229_v17 }
  0xef   :  { %2421 = vmatprep.subr.bf16.mxu0 %v3232_v18  ;;  %2446 = vmatprep.subr.bf16.mxu1 %v3040_v24 }
  0xf2   :  { %2423 = vmatpush1.bf16.msra.mxu0 %v3236_v25  ;;  %2448 = vmatpush3.bf16.msra.mxu1 %v3239_v27 }
  0xf3   :  { %2425 = vmatprep.subr.bf16.mxu0 %v3242_v28  ;;  %2449 = vmatprep.subr.bf16.mxu1 %v3040_v24 }
  0xf6   :  { %2427 = vmatpush1.bf16.msra.mxu0 %v3246_v35  ;;  %2451 = vmatpush3.bf16.msra.mxu1 %v3249_v36 }
  0xf7   :  { %2453 = vmatprep.subr.bf16.mxu0 %v3167_v39  ;;  %2484 = vmatprep.subr.bf16.mxu1 %v3040_v24 }
  0xf9   :  { %550 = vmatmul.mubr.f32.vlgmr.msra.gmra.mrb[2].mxu0 %v3257_v37  ;;  %2135 = vmatmul.mubr.f32.vlgmr.msra.gmra.mrb[2].mxu1 %v3257_v37 }
  0xfa   :  { %2455 = vmatpush1.bf16.msra.mxu0 %v3174_v29  ;;  %2486 = vmatpush3.bf16.msra.mxu1 %v3176_v32 }
  0xfb   :  { %2457 = vmatprep.subr.bf16.mxu0 %v3178_v34  ;;  %2487 = vmatprep.subr.bf16.mxu1 %v3040_v24 }
  0xfc   :  { %712 = vmatprep.mubr.f32.mxu0 %v3041_v40  ;;  %2169 = vmatprep.mubr.msk.f32.mxu1 %vm3042_vm0, %v3041_v40 }
  0xfe   :  { %2459 = vmatpush1.bf16.msra.mxu0 %v3183_v43  ;;  %2489 = vmatpush3.bf16.msra.mxu1 %v3186_v45 }
  0xff   :  { %2461 = vmatprep.subr.bf16.mxu0 %v3189_v46  ;;  %2490 = vmatprep.subr.bf16.mxu1 %v3040_v24 }
 0x102   :  { %2463 = vmatpush1.bf16.msra.mxu0 %v3196_v52  ;;  %2492 = vmatpush3.bf16.msra.mxu1 %v3199_v54 }
 0x103   :  { %2465 = vmatprep.subr.bf16.mxu0 %v3202_v55  ;;  %2493 = vmatprep.subr.bf16.mxu1 %v3040_v24 }
 0x106   :  { %2467 = vmatpush1.bf16.msra.mxu0 %v3206_v61  ;;  %2495 = vmatpush3.bf16.msra.mxu1 %v3209_v63 }
 0x107   :  { %2469 = vmatprep.subr.bf16.mxu0 %v3212_v0  ;;  %2496 = vmatprep.subr.bf16.mxu1 %v3040_v24 }
 0x10a   :  { %2471 = vmatpush1.bf16.msra.mxu0 %v3216_v6  ;;  %2498 = vmatpush3.bf16.msra.mxu1 %v3219_v8 }
 0x10b   :  { %2473 = vmatprep.subr.bf16.mxu0 %v3222_v9  ;;  %2499 = vmatprep.subr.bf16.mxu1 %v3040_v24 }
 0x10e   :  { %2475 = vmatpush1.bf16.msra.mxu0 %v3226_v15  ;;  %2501 = vmatpush3.bf16.msra.mxu1 %v3229_v17 }
 0x10f   :  { %2477 = vmatprep.subr.bf16.mxu0 %v3232_v18  ;;  %2502 = vmatprep.subr.bf16.mxu1 %v3040_v24 }
 0x112   :  { %2479 = vmatpush1.bf16.msra.mxu0 %v3236_v25  ;;  %2504 = vmatpush3.bf16.msra.mxu1 %v3239_v27 }
 0x113   :  { %2481 = vmatprep.subr.bf16.mxu0 %v3242_v28  ;;  %2505 = vmatprep.subr.bf16.mxu1 %v3040_v24 }
 0x116   :  { %2483 = vmatpush1.bf16.msra.mxu0 %v3246_v35  ;;  %2507 = vmatpush3.bf16.msra.mxu1 %v3249_v36 }
 0x117   :  { %2509 = vmatprep.subr.bf16.mxu0 %v3167_v39  ;;  %2540 = vmatprep.subr.bf16.mxu1 %v3040_v24 }
 0x1ac   :  { %v360_v38 = vpop.f32.mrb[0].mxu0  ;;  %v431_v41 = vpop.f32.mrb[0].mxu1 }
 0x1ad   :  { %v362_v42 = vpop.f32.mrb[1].mxu0  ;;  %v2101_v44 = vpop.f32.mrb[1].mxu1  ;;  %v3302_v57 = vadd.f32 %v360_v38, %v278_v53  ;;  %v3314_v21 = vadd.f32 %v431_v41, %v286_v14 }
 0x1ae   :  { %v3305_v2 = vadd.f32 %v362_v42, %v282_v56 }
 0x1cc   :  { %v551_v58 = vpop.f32.mrb[2].mxu0  ;;  %v622_v59 = vpop.f32.mrb[2].mxu1 }
 0x1cd   :  { %v626_v60 = vadd.f32 %v551_v58, %v3302_v57  ;;  %v553_v62 = vpop.f32.mrb[3].mxu0  ;;  %v2136_v1 = vpop.f32.mrb[3].mxu1  ;;  %v640_v19 = vadd.f32 %v622_v59, %v3311_v13 }
 0x1ce   :  { %v633_v4 = vadd.f32 %v553_v62, %v3305_v2 }
 0x1cf   :  { %v1934_v3 = vmul.f32 -1.442695, %v626_v60 }
 0x1d0   :  { %v1935_v5 = vmul.f32 -1.442695, %v633_v4 }
 0x1d1   :  { %2858 = vpow2.f32 %v1934_v3 }
 0x1d2   :  { %2860 = vpow2.f32 %v1935_v5 }
 0x1db   :  { %v2859_v7 = vpop.eup %2858 }
 0x1dc   :  { %v630_v10 = vadd.f32 1.0, %v2859_v7  ;;  %v2861_v12 = vpop.eup %2860 }
 0x1dd   :  { %v637_v16 = vadd.f32 1.0, %v2861_v12 }
 0x1de   :  { %2862 = vrcp.f32 %v630_v10 }
 0x1df   :  { %2864 = vrcp.f32 %v637_v16 }
 0x1e8   :  { %v2863_v20 = vpop.eup %2862 }
 0x1e9   :  { %v641_v22 = vmul.f32 %v2863_v20, %v640_v19  ;;  %v2865_v26 = vpop.eup %2864 }
 0x1ea   :  { %v644_v30 = vsub.f32 1.0, %v2865_v26  ;;  %v646_v38 = vmul.f32 %v2865_v26, %v3257_v37 }
 0x1eb   :  { %v642_v23 = vadd.f32 %v641_v22, %v3314_v21 }
 0x1ed   :  { %2866 = vtanh.f32 %v642_v23 }
 0x1f7   :  { %v2867_v31 = vpop.eup %2866 }
 0x1f8   :  { %v645_v33 = vmul.f32 %v2867_v31, %v644_v30 }
 0x1fa   :  { %v3318_v42 = vadd.f32 %v646_v38, %v645_v33 }
 0x1fc   :  { %713 = vmatmul.mubr.f32.vlgmr.msra.gmra.mrb[4].mxu0 %v3318_v42  ;;  %2170 = vmatmul.mubr.f32.vlgmr.msra.gmra.mrb[4].mxu1 %v3318_v42  ;;  %v819_v11 = vrot.slane %v3318_v42, 7 }
 0x1fd   :  { %2511 = vmatpush1.bf16.msra.mxu0 %v3174_v29  ;;  %2542 = vmatpush3.bf16.msra.mxu1 %v3176_v32 }
 0x1fe   :  { %2513 = vmatprep.subr.bf16.mxu0 %v3178_v34  ;;  %2543 = vmatprep.subr.bf16.mxu1 %v3040_v24 }
 0x1ff   :  { %890 = vmatprep.mubr.f32.mxu0 %v3041_v40  ;;  %2204 = vmatprep.mubr.msk.f32.mxu1 %vm3042_vm0, %v3041_v40 }
 0x201   :  { %2515 = vmatpush1.bf16.msra.mxu0 %v3183_v43  ;;  %2545 = vmatpush3.bf16.msra.mxu1 %v3186_v45 }
 0x202   :  { %2517 = vmatprep.subr.bf16.mxu0 %v3189_v46  ;;  %2546 = vmatprep.subr.bf16.mxu1 %v3040_v24 }
 0x205   :  { %2519 = vmatpush1.bf16.msra.mxu0 %v3196_v52  ;;  %2548 = vmatpush3.bf16.msra.mxu1 %v3199_v54 }
 0x206   :  { %2521 = vmatprep.subr.bf16.mxu0 %v3202_v55  ;;  %2549 = vmatprep.subr.bf16.mxu1 %v3040_v24 }
 0x209   :  { %2523 = vmatpush1.bf16.msra.mxu0 %v3206_v61  ;;  %2551 = vmatpush3.bf16.msra.mxu1 %v3209_v63 }
 0x20a   :  { %2525 = vmatprep.subr.bf16.mxu0 %v3212_v0  ;;  %2552 = vmatprep.subr.bf16.mxu1 %v3040_v24 }
 0x20d   :  { %2527 = vmatpush1.bf16.msra.mxu0 %v3216_v6  ;;  %2554 = vmatpush3.bf16.msra.mxu1 %v3219_v8 }
 0x20e   :  { %2529 = vmatprep.subr.bf16.mxu0 %v3222_v9  ;;  %2555 = vmatprep.subr.bf16.mxu1 %v3040_v24 }
 0x211   :  { %2531 = vmatpush1.bf16.msra.mxu0 %v3226_v15  ;;  %2557 = vmatpush3.bf16.msra.mxu1 %v3229_v17 }
 0x212   :  { %2533 = vmatprep.subr.bf16.mxu0 %v3232_v18  ;;  %2558 = vmatprep.subr.bf16.mxu1 %v3040_v24 }
 0x215   :  { %2535 = vmatpush1.bf16.msra.mxu0 %v3236_v25  ;;  %2560 = vmatpush3.bf16.msra.mxu1 %v3239_v27 }
 0x216   :  { %2537 = vmatprep.subr.bf16.mxu0 %v3242_v28  ;;  %2561 = vmatprep.subr.bf16.mxu1 %v3040_v24 }
 0x219   :  { %2539 = vmatpush1.bf16.msra.mxu0 %v3246_v35  ;;  %2563 = vmatpush3.bf16.msra.mxu1 %v3249_v36 }
 0x21a   :  { %2565 = vmatprep.subr.bf16.mxu0 %v3167_v39  ;;  %2596 = vmatprep.subr.bf16.mxu1 %v3040_v24 }
 0x2cf   :  { %v714_v37 = vpop.f32.mrb[4].mxu0  ;;  %v785_v41 = vpop.f32.mrb[4].mxu1 }
 0x2d0   :  { %v790_v44 = vrot.slane %v714_v37, 7  ;;  %v716_v47 = vpop.f32.mrb[5].mxu0  ;;  %v2171_v48 = vpop.f32.mrb[5].mxu1  ;;  %v809_v62 = vadd.f32 %v785_v41, %v3311_v13 }
 0x2d1   :  { %v800_v49 = vrot.slane %v716_v47, 7 }
 0x2d2   :  { %v792_v50 = vadd.f32 %v790_v44, %v3302_v57  ;;  %v811_v3 = vrot.slane %v809_v62, 7 }
 0x2d3   :  { %v802_v53 = vadd.f32 %v800_v49, %v3305_v2 }
 0x2d4   :  { %v1936_v51 = vmul.f32 -1.442695, %v792_v50 }
 0x2d5   :  { %v1937_v56 = vmul.f32 -1.442695, %v802_v53 }
 0x2d6   :  { %2868 = vpow2.f32 %v1936_v51 }
 0x2d7   :  { %2870 = vpow2.f32 %v1937_v56 }
 0x2e0   :  { %v2869_v58 = vpop.eup %2868 }
 0x2e1   :  { %v796_v59 = vadd.f32 1.0, %v2869_v58  ;;  %v2871_v60 = vpop.eup %2870 }
 0x2e2   :  { %v806_v1 = vadd.f32 1.0, %v2871_v60 }
 0x2e3   :  { %2872 = vrcp.f32 %v796_v59 }
 0x2e4   :  { %2874 = vrcp.f32 %v806_v1 }
 0x2ed   :  { %v2873_v4 = vpop.eup %2872 }
 0x2ee   :  { %v813_v5 = vmul.f32 %v2873_v4, %v811_v3  ;;  %v2875_v10 = vpop.eup %2874 }
 0x2ef   :  { %v816_v12 = vsub.f32 1.0, %v2875_v10  ;;  %v821_v19 = vmul.f32 %v2875_v10, %v819_v11 }
 0x2f0   :  { %v814_v7 = vadd.f32 %v813_v5, %v3314_v21 }
 0x2f2   :  { %2876 = vtanh.f32 %v814_v7 }
 0x2fc   :  { %v2877_v14 = vpop.eup %2876 }
 0x2fd   :  { %v817_v16 = vmul.f32 %v2877_v14, %v816_v12 }
 0x2ff   :  { %v3362_v20 = vadd.f32 %v821_v19, %v817_v16 }
 0x301   :  { %v824_v22 = vrot.slane %v3362_v20, 1  ;;  %v996_v59 = vrot.slane %v3362_v20, 7  ;;  %v1886_v11 = vsel %vm1885_vm3, %v3318_v42, %v3362_v20 }
 0x303   :  { %891 = vmatmul.mubr.f32.vlgmr.msra.gmra.mrb[6].mxu0 %v824_v22  ;;  %2205 = vmatmul.mubr.f32.vlgmr.msra.gmra.mrb[6].mxu1 %v824_v22 }
 0x304   :  { %2567 = vmatpush1.bf16.msra.mxu0 %v3174_v29  ;;  %2598 = vmatpush3.bf16.msra.mxu1 %v3176_v32 }
 0x305   :  { %2569 = vmatprep.subr.bf16.mxu0 %v3178_v34  ;;  %2599 = vmatprep.subr.bf16.mxu1 %v3040_v24 }
 0x306   :  { %1067 = vmatprep.mubr.f32.mxu0 %v3041_v40  ;;  %2239 = vmatprep.mubr.msk.f32.mxu1 %vm3042_vm0, %v3041_v40 }
 0x308   :  { %2571 = vmatpush1.bf16.msra.mxu0 %v3183_v43  ;;  %2601 = vmatpush3.bf16.msra.mxu1 %v3186_v45 }
 0x309   :  { %2573 = vmatprep.subr.bf16.mxu0 %v3189_v46  ;;  %2602 = vmatprep.subr.bf16.mxu1 %v3040_v24 }
 0x30c   :  { %2575 = vmatpush1.bf16.msra.mxu0 %v3196_v52  ;;  %2604 = vmatpush3.bf16.msra.mxu1 %v3199_v54 }
 0x30d   :  { %2577 = vmatprep.subr.bf16.mxu0 %v3202_v55  ;;  %2605 = vmatprep.subr.bf16.mxu1 %v3040_v24 }
 0x310   :  { %2579 = vmatpush1.bf16.msra.mxu0 %v3206_v61  ;;  %2607 = vmatpush3.bf16.msra.mxu1 %v3209_v63 }
 0x311   :  { %2581 = vmatprep.subr.bf16.mxu0 %v3212_v0  ;;  %2608 = vmatprep.subr.bf16.mxu1 %v3040_v24 }
 0x314   :  { %2583 = vmatpush1.bf16.msra.mxu0 %v3216_v6  ;;  %2610 = vmatpush3.bf16.msra.mxu1 %v3219_v8 }
 0x315   :  { %2585 = vmatprep.subr.bf16.mxu0 %v3222_v9  ;;  %2611 = vmatprep.subr.bf16.mxu1 %v3040_v24 }
 0x318   :  { %2587 = vmatpush1.bf16.msra.mxu0 %v3226_v15  ;;  %2613 = vmatpush3.bf16.msra.mxu1 %v3229_v17 }
 0x319   :  { %2589 = vmatprep.subr.bf16.mxu0 %v3232_v18  ;;  %2614 = vmatprep.subr.bf16.mxu1 %v3040_v24 }
 0x31c   :  { %2591 = vmatpush1.bf16.msra.mxu0 %v3236_v25  ;;  %2616 = vmatpush3.bf16.msra.mxu1 %v3239_v27 }
 0x31d   :  { %2593 = vmatprep.subr.bf16.mxu0 %v3242_v28  ;;  %2617 = vmatprep.subr.bf16.mxu1 %v3040_v24 }
 0x320   :  { %2595 = vmatpush1.bf16.msra.mxu0 %v3246_v35  ;;  %2619 = vmatpush3.bf16.msra.mxu1 %v3249_v36 }
 0x321   :  { %2621 = vmatprep.subr.bf16.mxu0 %v3167_v39  ;;  %2652 = vmatprep.subr.bf16.mxu1 %v3040_v24 }
 0x3d6   :  { %v892_v23 = vpop.f32.mrb[6].mxu0  ;;  %v963_v26 = vpop.f32.mrb[6].mxu1 }
 0x3d7   :  { %v968_v30 = vrot.slane %v892_v23, 6  ;;  %v894_v31 = vpop.f32.mrb[7].mxu0  ;;  %v2206_v33 = vpop.f32.mrb[7].mxu1  ;;  %v987_v53 = vadd.f32 %v963_v26, %v3311_v13 }
 0x3d8   :  { %v978_v38 = vrot.slane %v894_v31, 6 }
 0x3d9   :  { %v970_v37 = vadd.f32 %v968_v30, %v3302_v57  ;;  %v989_v56 = vrot.slane %v987_v53, 6 }
 0x3da   :  { %v980_v41 = vadd.f32 %v978_v38, %v3305_v2 }
 0x3db   :  { %v1938_v44 = vmul.f32 -1.442695, %v970_v37 }
 0x3dc   :  { %v1939_v47 = vmul.f32 -1.442695, %v980_v41 }
 0x3dd   :  { %2878 = vpow2.f32 %v1938_v44 }
 0x3de   :  { %2880 = vpow2.f32 %v1939_v47 }
 0x3e7   :  { %v2879_v48 = vpop.eup %2878 }
 0x3e8   :  { %v2881_v49 = vpop.eup %2880  ;;  %v974_v50 = vadd.f32 1.0, %v2879_v48 }
 0x3e9   :  { %v984_v51 = vadd.f32 1.0, %v2881_v49 }
 0x3ea   :  { %2882 = vrcp.f32 %v974_v50 }
 0x3eb   :  { %2884 = vrcp.f32 %v984_v51 }
 0x3f4   :  { %v2883_v58 = vpop.eup %2882 }
 0x3f5   :  { %v2885_v60 = vpop.eup %2884  ;;  %v991_v62 = vmul.f32 %v2883_v58, %v989_v56 }
 0x3f6   :  { %v998_v1 = vmul.f32 %v2885_v60, %v996_v59  ;;  %v994_v4 = vsub.f32 1.0, %v2885_v60 }
 0x3f7   :  { %v992_v3 = vadd.f32 %v991_v62, %v3314_v21 }
 0x3f9   :  { %2886 = vtanh.f32 %v992_v3 }
 0x403   :  { %v2887_v5 = vpop.eup %2886 }
 0x404   :  { %v995_v7 = vmul.f32 %v2887_v5, %v994_v4 }
 0x406   :  { %v3405_v10 = vadd.f32 %v998_v1, %v995_v7 }
 0x408   :  { %v1001_v12 = vrot.slane %v3405_v10, 2  ;;  %v3411_v14 = vsel %vm1887_vm4, %v1886_v11, %v3405_v10  ;;  %v1173_v50 = vrot.slane %v3405_v10, 7 }
 0x40a   :  { %1068 = vmatmul.mubr.f32.vlgmr.msra.gmra.mrb[8].mxu0 %v1001_v12  ;;  %2240 = vmatmul.mubr.f32.vlgmr.msra.gmra.mrb[8].mxu1 %v1001_v12 }
 0x40b   :  { %2623 = vmatpush1.bf16.msra.mxu0 %v3174_v29  ;;  %2654 = vmatpush3.bf16.msra.mxu1 %v3176_v32 }
 0x40c   :  { %2625 = vmatprep.subr.bf16.mxu0 %v3178_v34  ;;  %2655 = vmatprep.subr.bf16.mxu1 %v3040_v24 }
 0x40d   :  { %1244 = vmatprep.mubr.f32.mxu0 %v3041_v40  ;;  %2274 = vmatprep.mubr.msk.f32.mxu1 %vm3042_vm0, %v3041_v40 }
 0x40f   :  { %2627 = vmatpush1.bf16.msra.mxu0 %v3183_v43  ;;  %2657 = vmatpush3.bf16.msra.mxu1 %v3186_v45 }
 0x410   :  { %2629 = vmatprep.subr.bf16.mxu0 %v3189_v46  ;;  %2658 = vmatprep.subr.bf16.mxu1 %v3040_v24 }
 0x413   :  { %2631 = vmatpush1.bf16.msra.mxu0 %v3196_v52  ;;  %2660 = vmatpush3.bf16.msra.mxu1 %v3199_v54 }
 0x414   :  { %2633 = vmatprep.subr.bf16.mxu0 %v3202_v55  ;;  %2661 = vmatprep.subr.bf16.mxu1 %v3040_v24 }
 0x417   :  { %2635 = vmatpush1.bf16.msra.mxu0 %v3206_v61  ;;  %2663 = vmatpush3.bf16.msra.mxu1 %v3209_v63 }
 0x418   :  { %2637 = vmatprep.subr.bf16.mxu0 %v3212_v0  ;;  %2664 = vmatprep.subr.bf16.mxu1 %v3040_v24 }
 0x41b   :  { %2639 = vmatpush1.bf16.msra.mxu0 %v3216_v6  ;;  %2666 = vmatpush3.bf16.msra.mxu1 %v3219_v8 }
 0x41c   :  { %2641 = vmatprep.subr.bf16.mxu0 %v3222_v9  ;;  %2667 = vmatprep.subr.bf16.mxu1 %v3040_v24 }
 0x41f   :  { %2643 = vmatpush1.bf16.msra.mxu0 %v3226_v15  ;;  %2669 = vmatpush3.bf16.msra.mxu1 %v3229_v17 }
 0x420   :  { %2645 = vmatprep.subr.bf16.mxu0 %v3232_v18  ;;  %2670 = vmatprep.subr.bf16.mxu1 %v3040_v24 }
 0x423   :  { %2647 = vmatpush1.bf16.msra.mxu0 %v3236_v25  ;;  %2672 = vmatpush3.bf16.msra.mxu1 %v3239_v27 }
 0x424   :  { %2649 = vmatprep.subr.bf16.mxu0 %v3242_v28  ;;  %2673 = vmatprep.subr.bf16.mxu1 %v3040_v24 }
 0x427   :  { %2651 = vmatpush1.bf16.msra.mxu0 %v3246_v35  ;;  %2675 = vmatpush3.bf16.msra.mxu1 %v3249_v36 }
 0x428   :  { %2677 = vmatprep.subr.bf16.mxu0 %v3167_v39  ;;  %2708 = vmatprep.subr.bf16.mxu1 %v3040_v24 }
 0x4dd   :  { %v1069_v42 = vpop.f32.mrb[8].mxu0  ;;  %v1140_v16 = vpop.f32.mrb[8].mxu1 }
 0x4de   :  { %v1145_v19 = vrot.slane %v1069_v42, 5  ;;  %v1071_v20 = vpop.f32.mrb[9].mxu0  ;;  %v2241_v22 = vpop.f32.mrb[9].mxu1  ;;  %v1164_v47 = vadd.f32 %v1140_v16, %v3311_v13 }
 0x4df   :  { %v1155_v23 = vrot.slane %v1071_v20, 5 }
 0x4e0   :  { %v1147_v26 = vadd.f32 %v1145_v19, %v3302_v57  ;;  %v1166_v48 = vrot.slane %v1164_v47, 5 }
 0x4e1   :  { %v1157_v30 = vadd.f32 %v1155_v23, %v3305_v2 }
 0x4e2   :  { %v1940_v31 = vmul.f32 -1.442695, %v1147_v26 }
 0x4e3   :  { %v1941_v33 = vmul.f32 -1.442695, %v1157_v30 }
 0x4e4   :  { %2888 = vpow2.f32 %v1940_v31 }
 0x4e5   :  { %2890 = vpow2.f32 %v1941_v33 }
 0x4ee   :  { %v2889_v38 = vpop.eup %2888 }
 0x4ef   :  { %v2891_v37 = vpop.eup %2890  ;;  %v1151_v41 = vadd.f32 1.0, %v2889_v38 }
 0x4f0   :  { %v1161_v44 = vadd.f32 1.0, %v2891_v37 }
 0x4f1   :  { %2892 = vrcp.f32 %v1151_v41 }
 0x4f2   :  { %2894 = vrcp.f32 %v1161_v44 }
 0x4fb   :  { %v2893_v49 = vpop.eup %2892 }
 0x4fc   :  { %v2895_v51 = vpop.eup %2894  ;;  %v1168_v53 = vmul.f32 %v2893_v49, %v1166_v48 }
 0x4fd   :  { %v1175_v56 = vmul.f32 %v2895_v51, %v1173_v50  ;;  %v1171_v59 = vsub.f32 1.0, %v2895_v51 }
 0x4fe   :  { %v1169_v58 = vadd.f32 %v1168_v53, %v3314_v21 }
 0x500   :  { %2896 = vtanh.f32 %v1169_v58 }
 0x50a   :  { %v2897_v60 = vpop.eup %2896 }
 0x50b   :  { %v1172_v62 = vmul.f32 %v2897_v60, %v1171_v59 }
 0x50d   :  { %v3453_v1 = vadd.f32 %v1175_v56, %v1172_v62 }
 0x50f   :  { %v1178_v3 = vrot.slane %v3453_v1, 3  ;;  %v3458_v4 = vsel %vm1889_vm5, %v3411_v14, %v3453_v1  ;;  %v1350_v37 = vrot.slane %v3453_v1, 7 }
 0x511   :  { %1245 = vmatmul.mubr.f32.vlgmr.msra.gmra.mrb[10].mxu0 %v1178_v3  ;;  %2275 = vmatmul.mubr.f32.vlgmr.msra.gmra.mrb[10].mxu1 %v1178_v3 }
 0x512   :  { %2679 = vmatpush1.bf16.msra.mxu0 %v3174_v29  ;;  %2710 = vmatpush3.bf16.msra.mxu1 %v3176_v32 }
 0x513   :  { %2681 = vmatprep.subr.bf16.mxu0 %v3178_v34  ;;  %2711 = vmatprep.subr.bf16.mxu1 %v3040_v24 }
 0x514   :  { %1421 = vmatprep.mubr.f32.mxu0 %v3041_v40  ;;  %2309 = vmatprep.mubr.msk.f32.mxu1 %vm3042_vm0, %v3041_v40 }
 0x516   :  { %2683 = vmatpush1.bf16.msra.mxu0 %v3183_v43  ;;  %2713 = vmatpush3.bf16.msra.mxu1 %v3186_v45 }
 0x517   :  { %2685 = vmatprep.subr.bf16.mxu0 %v3189_v46  ;;  %2714 = vmatprep.subr.bf16.mxu1 %v3040_v24 }
 0x51a   :  { %2687 = vmatpush1.bf16.msra.mxu0 %v3196_v52  ;;  %2716 = vmatpush3.bf16.msra.mxu1 %v3199_v54 }
 0x51b   :  { %2689 = vmatprep.subr.bf16.mxu0 %v3202_v55  ;;  %2717 = vmatprep.subr.bf16.mxu1 %v3040_v24 }
 0x51e   :  { %2691 = vmatpush1.bf16.msra.mxu0 %v3206_v61  ;;  %2719 = vmatpush3.bf16.msra.mxu1 %v3209_v63 }
 0x51f   :  { %2693 = vmatprep.subr.bf16.mxu0 %v3212_v0  ;;  %2720 = vmatprep.subr.bf16.mxu1 %v3040_v24 }
 0x522   :  { %2695 = vmatpush1.bf16.msra.mxu0 %v3216_v6  ;;  %2722 = vmatpush3.bf16.msra.mxu1 %v3219_v8 }
 0x523   :  { %2697 = vmatprep.subr.bf16.mxu0 %v3222_v9  ;;  %2723 = vmatprep.subr.bf16.mxu1 %v3040_v24 }
 0x526   :  { %2699 = vmatpush1.bf16.msra.mxu0 %v3226_v15  ;;  %2725 = vmatpush3.bf16.msra.mxu1 %v3229_v17 }
 0x527   :  { %2701 = vmatprep.subr.bf16.mxu0 %v3232_v18  ;;  %2726 = vmatprep.subr.bf16.mxu1 %v3040_v24 }
 0x52a   :  { %2703 = vmatpush1.bf16.msra.mxu0 %v3236_v25  ;;  %2728 = vmatpush3.bf16.msra.mxu1 %v3239_v27 }
 0x52b   :  { %2705 = vmatprep.subr.bf16.mxu0 %v3242_v28  ;;  %2729 = vmatprep.subr.bf16.mxu1 %v3040_v24 }
 0x52e   :  { %2707 = vmatpush1.bf16.msra.mxu0 %v3246_v35  ;;  %2731 = vmatpush3.bf16.msra.mxu1 %v3249_v36 }
 0x52f   :  { %2733 = vmatprep.subr.bf16.mxu0 %v3167_v39  ;;  %2764 = vmatprep.subr.bf16.mxu1 %v3040_v24 }
 0x5e4   :  { %v1246_v5 = vpop.f32.mrb[10].mxu0  ;;  %v1317_v7 = vpop.f32.mrb[10].mxu1 }
 0x5e5   :  { %v1322_v10 = vrot.slane %v1246_v5, 4  ;;  %v1248_v11 = vpop.f32.mrb[11].mxu0  ;;  %v2276_v12 = vpop.f32.mrb[11].mxu1  ;;  %v1341_v31 = vadd.f32 %v1317_v7, %v3311_v13 }
 0x5e6   :  { %v1332_v14 = vrot.slane %v1248_v11, 4 }
 0x5e7   :  { %v1324_v42 = vadd.f32 %v1322_v10, %v3302_v57  ;;  %v1343_v33 = vrot.slane %v1341_v31, 4 }
 0x5e8   :  { %v1334_v16 = vadd.f32 %v1332_v14, %v3305_v2 }
 0x5e9   :  { %v1942_v19 = vmul.f32 -1.442695, %v1324_v42 }
 0x5ea   :  { %v1943_v20 = vmul.f32 -1.442695, %v1334_v16 }
 0x5eb   :  { %2898 = vpow2.f32 %v1942_v19 }
 0x5ec   :  { %2900 = vpow2.f32 %v1943_v20 }
 0x5f5   :  { %v2899_v22 = vpop.eup %2898 }
 0x5f6   :  { %v2901_v23 = vpop.eup %2900  ;;  %v1328_v26 = vadd.f32 1.0, %v2899_v22 }
 0x5f7   :  { %v1338_v30 = vadd.f32 1.0, %v2901_v23 }
 0x5f8   :  { %2902 = vrcp.f32 %v1328_v26 }
 0x5f9   :  { %2904 = vrcp.f32 %v1338_v30 }
 0x602   :  { %v2903_v38 = vpop.eup %2902 }
 0x603   :  { %v2905_v41 = vpop.eup %2904  ;;  %v1345_v44 = vmul.f32 %v2903_v38, %v1343_v33 }
 0x604   :  { %v1352_v47 = vmul.f32 %v2905_v41, %v1350_v37  ;;  %v1348_v49 = vsub.f32 1.0, %v2905_v41 }
 0x605   :  { %v1346_v48 = vadd.f32 %v1345_v44, %v3314_v21 }
 0x607   :  { %2906 = vtanh.f32 %v1346_v48 }
 0x611   :  { %v2907_v50 = vpop.eup %2906 }
 0x612   :  { %v1349_v51 = vmul.f32 %v2907_v50, %v1348_v49 }
 0x614   :  { %v3500_v53 = vadd.f32 %v1352_v47, %v1349_v51 }
 0x616   :  { %v1355_v56 = vrot.slane %v3500_v53, 4  ;;  %v3505_v58 = vsel %vm1891_vm6, %v3458_v4, %v3500_v53  ;;  %v1527_v22 = vrot.slane %v3500_v53, 7 }
 0x618   :  { %1422 = vmatmul.mubr.f32.vlgmr.msra.gmra.mrb[12].mxu0 %v1355_v56  ;;  %2310 = vmatmul.mubr.f32.vlgmr.msra.gmra.mrb[12].mxu1 %v1355_v56 }
 0x619   :  { %2735 = vmatpush1.bf16.msra.mxu0 %v3174_v29  ;;  %2766 = vmatpush3.bf16.msra.mxu1 %v3176_v32 }
 0x61a   :  { %2737 = vmatprep.subr.bf16.mxu0 %v3178_v34  ;;  %2767 = vmatprep.subr.bf16.mxu1 %v3040_v24 }
 0x61b   :  { %1598 = vmatprep.mubr.f32.mxu0 %v3041_v40  ;;  %2344 = vmatprep.mubr.msk.f32.mxu1 %vm3042_vm0, %v3041_v40 }
 0x61d   :  { %2739 = vmatpush1.bf16.msra.mxu0 %v3183_v43  ;;  %2769 = vmatpush3.bf16.msra.mxu1 %v3186_v45 }
 0x61e   :  { %2741 = vmatprep.subr.bf16.mxu0 %v3189_v46  ;;  %2770 = vmatprep.subr.bf16.mxu1 %v3040_v24 }
 0x621   :  { %2743 = vmatpush1.bf16.msra.mxu0 %v3196_v52  ;;  %2772 = vmatpush3.bf16.msra.mxu1 %v3199_v54 }
 0x622   :  { %2745 = vmatprep.subr.bf16.mxu0 %v3202_v55  ;;  %2773 = vmatprep.subr.bf16.mxu1 %v3040_v24 }
 0x625   :  { %2747 = vmatpush1.bf16.msra.mxu0 %v3206_v61  ;;  %2775 = vmatpush3.bf16.msra.mxu1 %v3209_v63 }
 0x626   :  { %2749 = vmatprep.subr.bf16.mxu0 %v3212_v0  ;;  %2776 = vmatprep.subr.bf16.mxu1 %v3040_v24 }
 0x629   :  { %2751 = vmatpush1.bf16.msra.mxu0 %v3216_v6  ;;  %2778 = vmatpush3.bf16.msra.mxu1 %v3219_v8 }
 0x62a   :  { %2753 = vmatprep.subr.bf16.mxu0 %v3222_v9  ;;  %2779 = vmatprep.subr.bf16.mxu1 %v3040_v24 }
 0x62d   :  { %2755 = vmatpush1.bf16.msra.mxu0 %v3226_v15  ;;  %2781 = vmatpush3.bf16.msra.mxu1 %v3229_v17 }
 0x62e   :  { %2757 = vmatprep.subr.bf16.mxu0 %v3232_v18  ;;  %2782 = vmatprep.subr.bf16.mxu1 %v3040_v24 }
 0x631   :  { %2759 = vmatpush1.bf16.msra.mxu0 %v3236_v25  ;;  %2784 = vmatpush3.bf16.msra.mxu1 %v3239_v27 }
 0x632   :  { %2761 = vmatprep.subr.bf16.mxu0 %v3242_v28  ;;  %2785 = vmatprep.subr.bf16.mxu1 %v3040_v24 }
 0x635   :  { %2763 = vmatpush1.bf16.msra.mxu0 %v3246_v35  ;;  %2787 = vmatpush3.bf16.msra.mxu1 %v3249_v36 }
 0x636   :  { %2789 = vmatprep.subr.bf16.mxu0 %v3167_v39  ;;  %2820 = vmatprep.subr.bf16.mxu1 %v3040_v24 }
 0x6eb   :  { %v1423_v59 = vpop.f32.mrb[12].mxu0  ;;  %v1494_v60 = vpop.f32.mrb[12].mxu1 }
 0x6ec   :  { %v1499_v62 = vrot.slane %v1423_v59, 3  ;;  %v1425_v1 = vpop.f32.mrb[13].mxu0  ;;  %v2311_v3 = vpop.f32.mrb[13].mxu1  ;;  %v1518_v16 = vadd.f32 %v1494_v60, %v3311_v13 }
 0x6ed   :  { %v1509_v4 = vrot.slane %v1425_v1, 3 }
 0x6ee   :  { %v1501_v5 = vadd.f32 %v1499_v62, %v3302_v57  ;;  %v1520_v19 = vrot.slane %v1518_v16, 3 }
 0x6ef   :  { %v1511_v7 = vadd.f32 %v1509_v4, %v3305_v2 }
 0x6f0   :  { %v1944_v10 = vmul.f32 -1.442695, %v1501_v5 }
 0x6f1   :  { %v1945_v11 = vmul.f32 -1.442695, %v1511_v7 }
 0x6f2   :  { %2908 = vpow2.f32 %v1944_v10 }
 0x6f3   :  { %2910 = vpow2.f32 %v1945_v11 }
 0x6fc   :  { %v2909_v12 = vpop.eup %2908 }
 0x6fd   :  { %v2911_v14 = vpop.eup %2910  ;;  %v1505_v42 = vadd.f32 1.0, %v2909_v12 }
 0x6fe   :  { %v1515_v39 = vadd.f32 1.0, %v2911_v14 }
 0x6ff   :  { %2912 = vrcp.f32 %v1505_v42 }
 0x700   :  { %2914 = vrcp.f32 %v1515_v39 }
 0x709   :  { %v2913_v20 = vpop.eup %2912 }
 0x70a   :  { %v2915_v23 = vpop.eup %2914  ;;  %v1522_v26 = vmul.f32 %v2913_v20, %v1520_v19 }
 0x70b   :  { %v1529_v30 = vmul.f32 %v2915_v23, %v1527_v22  ;;  %v1525_v33 = vsub.f32 1.0, %v2915_v23 }
 0x70c   :  { %v1523_v31 = vadd.f32 %v1522_v26, %v3314_v21 }
 0x70e   :  { %2916 = vtanh.f32 %v1523_v31 }
 0x718   :  { %v2917_v38 = vpop.eup %2916 }
 0x719   :  { %v1526_v37 = vmul.f32 %v2917_v38, %v1525_v33 }
 0x71b   :  { %v1530_v41 = vadd.f32 %v1529_v30, %v1526_v37 }
 0x71d   :  { %v1532_v44 = vrot.slane %v1530_v41, 5  ;;  %v3548_v47 = vsel %vm1893_vm7, %v3505_v58, %v1530_v41 }
 0x71f   :  { %1599 = vmatmul.mubr.f32.vlgmr.msra.gmra.mrb[14].mxu0 %v1532_v44  ;;  %2345 = vmatmul.mubr.f32.vlgmr.msra.gmra.mrb[14].mxu1 %v1532_v44 }
 0x720   :  { %2791 = vmatpush1.bf16.msra.mxu0 %v3174_v29  ;;  %2822 = vmatpush3.bf16.msra.mxu1 %v3176_v32 }
 0x721   :  { %2793 = vmatprep.subr.bf16.mxu0 %v3178_v34  ;;  %2823 = vmatprep.subr.bf16.mxu1 %v3040_v24 }
 0x722   :  { %1775 = vmatprep.mubr.f32.mxu0 %v3041_v40  ;;  %2379 = vmatprep.mubr.msk.f32.mxu1 %vm3042_vm0, %v3041_v40  ;;  %vm1895_vm0 = vcmask 1045504  }
 0x724   :  { %2795 = vmatpush1.bf16.msra.mxu0 %v3183_v43  ;;  %2825 = vmatpush3.bf16.msra.mxu1 %v3186_v45 }
 0x725   :  { %2797 = vmatprep.subr.bf16.mxu0 %v3189_v46  ;;  %2826 = vmatprep.subr.bf16.mxu1 %v3040_v24 }
 0x728   :  { %2799 = vmatpush1.bf16.msra.mxu0 %v3196_v52  ;;  %2828 = vmatpush3.bf16.msra.mxu1 %v3199_v54 }
 0x729   :  { %2801 = vmatprep.subr.bf16.mxu0 %v3202_v55  ;;  %2829 = vmatprep.subr.bf16.mxu1 %v3040_v24 }
 0x72c   :  { %2803 = vmatpush1.bf16.msra.mxu0 %v3206_v61  ;;  %2831 = vmatpush3.bf16.msra.mxu1 %v3209_v63 }
 0x72d   :  { %2805 = vmatprep.subr.bf16.mxu0 %v3212_v0  ;;  %2832 = vmatprep.subr.bf16.mxu1 %v3040_v24 }
 0x730   :  { %2807 = vmatpush1.bf16.msra.mxu0 %v3216_v6  ;;  %2834 = vmatpush3.bf16.msra.mxu1 %v3219_v8 }
 0x731   :  { %2809 = vmatprep.subr.bf16.mxu0 %v3222_v9  ;;  %2835 = vmatprep.subr.bf16.mxu1 %v3040_v24 }
 0x734   :  { %2811 = vmatpush1.bf16.msra.mxu0 %v3226_v15  ;;  %2837 = vmatpush3.bf16.msra.mxu1 %v3229_v17  ;;  %v1704_v15 = vrot.slane %v1530_v41, 7 }
 0x735   :  { %2813 = vmatprep.subr.bf16.mxu0 %v3232_v18  ;;  %2838 = vmatprep.subr.bf16.mxu1 %v3040_v24 }
 0x738   :  { %2815 = vmatpush1.bf16.msra.mxu0 %v3236_v25  ;;  %2840 = vmatpush3.bf16.msra.mxu1 %v3239_v27 }
 0x739   :  { %2817 = vmatprep.subr.bf16.mxu0 %v3242_v28  ;;  %2841 = vmatprep.subr.bf16.mxu1 %v3040_v24 }
 0x73c   :  { %2819 = vmatpush1.bf16.msra.mxu0 %v3246_v35  ;;  %2843 = vmatpush3.bf16.msra.mxu1 %v3249_v36 }
 0x7f2   :  { %v1600_v40 = vpop.f32.mrb[14].mxu0  ;;  %v1671_v29 = vpop.f32.mrb[14].mxu1 }
 0x7f3   :  { %v1676_v32 = vrot.slane %v1600_v40, 2  ;;  %v1602_v34 = vpop.f32.mrb[15].mxu0  ;;  %v2346_v43 = vpop.f32.mrb[15].mxu1  ;;  %v1695_v6 = vadd.f32 %v1671_v29, %v3311_v13 }
 0x7f4   :  { %v1686_v45 = vrot.slane %v1602_v34, 2 }
 0x7f5   :  { %v1678_v46 = vadd.f32 %v1676_v32, %v3302_v57  ;;  %v1697_v8 = vrot.slane %v1695_v6, 2 }
 0x7f6   :  { %v1688_v52 = vadd.f32 %v1686_v45, %v3305_v2 }
 0x7f7   :  { %v1946_v54 = vmul.f32 -1.442695, %v1678_v46 }
 0x7f8   :  { %v1947_v55 = vmul.f32 -1.442695, %v1688_v52 }
 0x7f9   :  { %2918 = vpow2.f32 %v1946_v54 }
 0x7fa   :  { %2920 = vpow2.f32 %v1947_v55 }
 0x803   :  { %v2919_v61 = vpop.eup %2918 }
 0x804   :  { %v2921_v24 = vpop.eup %2920  ;;  %v1682_v63 = vadd.f32 1.0, %v2919_v61 }
 0x805   :  { %v1692_v0 = vadd.f32 1.0, %v2921_v24 }
 0x806   :  { %2922 = vrcp.f32 %v1682_v63 }
 0x807   :  { %2924 = vrcp.f32 %v1692_v0 }
 0x810   :  { %v2923_v9 = vpop.eup %2922 }
 0x811   :  { %v2925_v17 = vpop.eup %2924  ;;  %v1699_v18 = vmul.f32 %v2923_v9, %v1697_v8 }
 0x812   :  { %v1706_v25 = vmul.f32 %v2925_v17, %v1704_v15  ;;  %v1702_v28 = vsub.f32 1.0, %v2925_v17 }
 0x813   :  { %v1700_v27 = vadd.f32 %v1699_v18, %v3314_v21 }
 0x815   :  { %2926 = vtanh.f32 %v1700_v27 }
 0x81f   :  { %v2927_v35 = vpop.eup %2926 }
 0x820   :  { %v1703_v36 = vmul.f32 %v2927_v35, %v1702_v28 }
 0x822   :  { %v1707_v48 = vadd.f32 %v1706_v25, %v1703_v36 }
 0x824   :  { %v1709_v49 = vrot.slane %v1707_v48, 6  ;;  %v1896_v50 = vsel %vm1895_vm0, %v3548_v47, %v1707_v48  ;;  %v1881_v39 = vrot.slane %v1707_v48, 7 }
 0x826   :  { %1776 = vmatmul.mubr.f32.vlgmr.msra.gmra.mrb[16].mxu0 %v1709_v49  ;;  %2380 = vmatmul.mubr.f32.vlgmr.msra.gmra.mrb[16].mxu1 %v1709_v49 }
 0x8f9   :  { %v1777_v51 = vpop.f32.mrb[16].mxu0  ;;  %v1848_v53 = vpop.f32.mrb[16].mxu1 }
 0x8fa   :  { %v1853_v56 = vrot.slane %v1777_v51, 1  ;;  %v1779_v58 = vpop.f32.mrb[17].mxu0  ;;  %v2381_v59 = vpop.f32.mrb[17].mxu1  ;;  %v1872_v12 = vadd.f32 %v1848_v53, %v3311_v13 }
 0x8fb   :  { %v1863_v60 = vrot.slane %v1779_v58, 1 }
 0x8fc   :  { %v1855_v62 = vadd.f32 %v1853_v56, %v3302_v57  ;;  %v1874_v14 = vrot.slane %v1872_v12, 1 }
 0x8fd   :  { %v1865_v1 = vadd.f32 %v1863_v60, %v3305_v2 }
 0x8fe   :  { %v1948_v3 = vmul.f32 -1.442695, %v1855_v62 }
 0x8ff   :  { %v1949_v4 = vmul.f32 -1.442695, %v1865_v1 }
 0x900   :  { %2928 = vpow2.f32 %v1948_v3 }
 0x901   :  { %2930 = vpow2.f32 %v1949_v4 }
 0x90a   :  { %v2929_v5 = vpop.eup %2928 }
 0x90b   :  { %v2931_v7 = vpop.eup %2930  ;;  %v1859_v10 = vadd.f32 1.0, %v2929_v5 }
 0x90c   :  { %v1869_v11 = vadd.f32 1.0, %v2931_v7 }
 0x90d   :  { %2932 = vrcp.f32 %v1859_v10 }
 0x90e   :  { %2934 = vrcp.f32 %v1869_v11 }
 0x917   :  { %v2933_v42 = vpop.eup %2932 }
 0x918   :  { %v2935_v16 = vpop.eup %2934  ;;  %v1876_v19 = vmul.f32 %v2933_v42, %v1874_v14 }
 0x919   :  { %v1883_v57 = vmul.f32 %v2935_v16, %v1881_v39  ;;  %v1879_v20 = vsub.f32 1.0, %v2935_v16 }
 0x91a   :  { %v1877_v2 = vadd.f32 %v1876_v19, %v3314_v21 }
 0x91c   :  { %2936 = vtanh.f32 %v1877_v2 }
 0x926   :  { %v2937_v22 = vpop.eup %2936 }
 0x927   :  { %v1880_v23 = vmul.f32 %v2937_v22, %v1879_v20 }
 0x929   :  { %v1884_v26 = vadd.f32 %v1883_v57, %v1880_v23 }
 0x92b   :  { %v1898_v30 = vsel %vm1897_vm8, %v1896_v50, %v1884_v26 }
 0x92c   :  { %1899 = vst.msk [vmem:[#allocation8] sm:$0xff] %vm290_vm15, %v1898_v30 }
 0x92d   :  { %3015 = shalt.err (!%p3012_p0)
}
 0x92e   :  { %s3016_s24 = scalar_lea.hbm %s3612_s7, 128 }
 0x92f   :  { %p3017_p1 = scmp.ne.s32.totalorder %s3612_s7, %s3016_s24  ;;  %p3020_p2 = scmp.lt.u32.totalorder %s3016_s24, %s3612_s7 }
 0x931   :  { %p3022_p3 = pnand %p3020_p2, %p3017_p1 }
 0x933   :  { %3025 = shalt.err (!%p3022_p3)
}
 0x934   :  { %1909 = dma.vmem_to_hbm [thread:$0]  %s1907_s20, 128, %s3612_s7, [#allocation4]  }
 0x935   :  { %3030 = dma.done.wait [#allocation4], 128  }
 0x936   :  { %3031 = vsyncadd [#allocation4], 4294967168 }
 0x937   :  { %1913 = vsyncpa [#allocation3], 1 }
 0x938   :  { %1914 = vsyncpa [#allocation6], 1 }
 0x939   :  { %1915 = vsyncpa [#allocation4], 1 }

</bundles_post_ra>
